<compile_context>
chip_gen: v7x
topology: tpu7x:2x2x1
jax: 0.10.0
libtpu: 0.0.40
codegen_flags: <defaults>
</compile_context>

<pallas_src>
import functools
import math

import jax
import jax.numpy as jnp
from jax.experimental import pallas as pl
from jax.experimental.pallas import tpu as pltpu

# ---- small synthetic GPT-2 config ------------------------------------------
VOCAB = 64
VOCAB_PAD = 128            # unembed padded to 128 lanes for dense stores
D_MODEL = 32
N_HEAD = 4
D_HEAD = D_MODEL // N_HEAD
N_CTX = 8
N_LAYER = 2
D_MLP = 4 * D_MODEL        # 128
INIT_RANGE = 0.02
LN_EPS = 1e-5
NEG_FILL = -100000.0       # masked_fill value from the reference implementation

BATCH = 2
SEQ = 8                    # == N_CTX


# ---- in-kernel helpers (f32 elementwise everywhere; v5e has no bf16 VPU/EUP) ----
def _layernorm(x, g, b):
    mu = jnp.mean(x, axis=-1, keepdims=True)
    var = jnp.mean((x - mu) * (x - mu), axis=-1, keepdims=True)
    return (x - mu) * jax.lax.rsqrt(var + LN_EPS) * g + b


def _gelu(x):
    # exact (erf-based) GELU, matching torch.nn.GELU() default
    return 0.5 * x * (1.0 + jax.lax.erf(x / jnp.sqrt(jnp.float32(2.0))))


# ---- fully fused GPT-2 forward kernel ---------------------------------------
def gpt2_fused_kernel(
    x_ref,
    ln1g_ref, ln1b_ref, wqkv_ref, bqkv_ref, wo_ref, bo_ref,
    ln2g_ref, ln2b_ref, w1_ref, b1_ref, w2_ref, b2_ref,
    lnfg_ref, lnfb_ref, wu_ref, bu_ref,
    o_ref,
    *, n_layer, n_head, d_head, batch, seq,
):
    d_model = n_head * d_head
    rows = batch * seq
    x = x_ref[...]                                   # (B*T, D) f32 residual stream

    # Block-diagonal causal mask over the flat B*T axis, hoisted out of the layer
    # loop (built once).  "Same batch" is expressed with per-boundary compares --
    # no vector integer division needed.
    r = jax.lax.broadcasted_iota(jnp.int32, (rows, rows), 0)
    c = jax.lax.broadcasted_iota(jnp.int32, (rows, rows), 1)
    mask = r >= c
    for b in range(1, batch):
        m = b * seq
        mask = mask & (((r >= m) & (c >= m)) | ((r < m) & (c < m)))
    mask = mask[None, :, :]                          # (1, B*T, B*T), broadcasts over heads

    for l in range(n_layer):                         # static unroll; weights VMEM-resident
        # ---------------- LayerNorm + causal self-attention ----------------
        h = _layernorm(x, ln1g_ref[l], ln1b_ref[l])
        # fused QKV projection: one 96-lane matmul (bf16 weights, f32 accumulation).
        # NOTE: 1/sqrt(d_head) is already folded into the Q columns / Q bias (init-time).
        qkv = jnp.dot(h.astype(jnp.bfloat16), wqkv_ref[l],
                      preferred_element_type=jnp.float32) + bqkv_ref[l]   # (B*T, 3D) f32

        def split_heads(base, qkv=qkv):
            # ONE pass over the full (B*T, .) slab -> (H, B*T, Dh); f32, no bf16 packing
            return jnp.stack(
                [qkv[:, base + hh * d_head: base + (hh + 1) * d_head]
                 for hh in range(n_head)], axis=0)

        q = split_heads(0)
        k = split_heads(d_model)
        v = split_heads(2 * d_model)

        # ONE score einsum / masked softmax / context einsum for ALL (batch, head)
        # pairs; the block-diagonal mask keeps batches independent.
        s = jnp.einsum('hqd,hkd->hqk', q, k,
                       preferred_element_type=jnp.float32)        # (H, B*T, B*T)
        s = jnp.where(mask, s, jnp.float32(NEG_FILL))
        s = s - jnp.max(s, axis=-1, keepdims=True)
        p = jnp.exp(s)
        p = p * pl.reciprocal(jnp.sum(p, axis=-1, keepdims=True), approx=True)  # EUP
        z = jnp.einsum('hqk,hkd->hqd', p, v,
                       preferred_element_type=jnp.float32)        # (H, B*T, Dh)

        # merge heads + output projection WITHOUT a lane-axis concatenate:
        # attn = sum_h  z_h @ Wo_h   (leading-axis sum == cheap VPU tile adds)
        ctx = jnp.einsum('hrd,hdm->hrm', z, wo_ref[l],
                         preferred_element_type=jnp.float32)      # (H, B*T, D)
        attn = jnp.sum(ctx, axis=0) + bo_ref[l]                   # (B*T, D)
        # TODO(synk): attn/resid dropout are identity (eval mode); training-mode
        # dropout would use pltpu.prng_seed / pltpu.prng_random_bits.
        x = x + attn

        # ------------- LayerNorm + MLP (== the spec'd MLP module) -------------
        h2 = _layernorm(x, ln2g_ref[l], ln2b_ref[l])
        m2 = jnp.dot(h2.astype(jnp.bfloat16), w1_ref[l],
                     preferred_element_type=jnp.float32) + b1_ref[l]      # fc1
        m2 = _gelu(m2)                                                    # act (f32)
        m2 = jnp.dot(m2.astype(jnp.bfloat16), w2_ref[l],
                     preferred_element_type=jnp.float32) + b2_ref[l]      # fc2
        x = x + m2                                   # MLP dropout = identity (eval)

    # ------------- final LayerNorm + unembed (lane-dense padded vocab) -------------
    hf = _layernorm(x, lnfg_ref[...], lnfb_ref[...])
    o_ref[...] = jnp.dot(hf.astype(jnp.bfloat16), wu_ref[...],
                         preferred_element_type=jnp.float32) + bu_ref[...]


# ---- wrapper ----------------------------------------------------------------
def gpt2_forward(input_ids, params):
    B, T = input_ids.shape
    # token + positional embedding gather is glue; done in plain JAX outside the kernel.
    x = params["wte"][input_ids] + params["wpe"][jnp.arange(T)]
    x = x.reshape(B * T, D_MODEL).astype(jnp.float32)

    args = (
        x,
        params["ln1_g"], params["ln1_b"], params["wqkv"], params["bqkv"],
        params["wo"], params["bo"],
        params["ln2_g"], params["ln2_b"], params["w1"], params["b1"],
        params["w2"], params["b2"],
        params["lnf_g"], params["lnf_b"], params["wu"], params["bu"],
    )
    logits_pad = pl.pallas_call(
        functools.partial(gpt2_fused_kernel, n_layer=N_LAYER, n_head=N_HEAD,
                          d_head=D_HEAD, batch=B, seq=T),
        out_shape=jax.ShapeDtypeStruct((B * T, VOCAB_PAD), jnp.float32),
        in_specs=[pl.BlockSpec(memory_space=pltpu.MemorySpace.VMEM) for _ in args],
        out_specs=pl.BlockSpec(memory_space=pltpu.MemorySpace.VMEM),
    )(*args)
    return logits_pad[:, :VOCAB].reshape(B, T, VOCAB)


# ---- pure-JAX reference (f32 math, same bf16-valued weights) ----------------
def gpt2_forward_ref(input_ids, params):
    B, T = input_ids.shape
    D, H, Dh = D_MODEL, N_HEAD, D_HEAD
    x = params["wte"][input_ids] + params["wpe"][jnp.arange(T)]           # (B, T, D)
    causal = jnp.tril(jnp.ones((T, T), dtype=bool))
    for l in range(N_LAYER):
        h = _layernorm(x, params["ln1_g"][l], params["ln1_b"][l])
        qkv = h @ params["wqkv"][l].astype(jnp.float32) + params["bqkv"][l]
        q, k, v = jnp.split(qkv, 3, axis=-1)
        heads = lambda a: a.reshape(B, T, H, Dh).transpose(0, 2, 1, 3)    # (B,H,T,Dh)
        q, k, v = heads(q), heads(k), heads(v)
        # NOTE: the 1/sqrt(d_head) scale is folded into the Q weight/bias at init
        # time (math-identical to GPT-2's explicit scale), so no scale here.
        s = q @ jnp.swapaxes(k, -1, -2)
        s = jnp.where(causal, s, NEG_FILL)
        p = jax.nn.softmax(s, axis=-1)
        z = (p @ v).transpose(0, 2, 1, 3).reshape(B, T, D)
        wo = params["wo"][l].astype(jnp.float32).reshape(D, D)
        x = x + z @ wo + params["bo"][l]
        h2 = _layernorm(x, params["ln2_g"][l], params["ln2_b"][l])
        m = h2 @ params["w1"][l].astype(jnp.float32) + params["b1"][l]
        m = _gelu(m)
        x = x + m @ params["w2"][l].astype(jnp.float32) + params["b2"][l]
    h = _layernorm(x, params["lnf_g"], params["lnf_b"])
    logits = h @ params["wu"].astype(jnp.float32) + params["bu"]
    return logits[..., :VOCAB]


# ---- deterministic parameter init -------------------------------------------
def init_params(key):
    ks = iter(jax.random.split(key, 16))

    def nrm(shape, dtype=jnp.float32):
        w = INIT_RANGE * jax.random.normal(next(ks), shape, dtype=jnp.float32)
        return w.astype(dtype)

    L, D, Dm = N_LAYER, D_MODEL, D_MLP
    q_scale = jnp.float32(1.0 / math.sqrt(D_HEAD))
    # fused [Wq | Wk | Wv]; attention scale folded into Q columns + Q bias at INIT
    # time (zero runtime cost, math-identical to the explicit per-score multiply).
    wqkv = nrm((L, D, 3 * D)).at[:, :, :D].multiply(q_scale).astype(jnp.bfloat16)
    bqkv = nrm((L, 1, 3 * D)).at[:, :, :D].multiply(q_scale)
    wu = jnp.zeros((D, VOCAB_PAD), jnp.float32).at[:, :VOCAB].set(nrm((D, VOCAB)))
    bu = jnp.zeros((1, VOCAB_PAD), jnp.float32).at[:, :VOCAB].set(nrm((1, VOCAB)))
    return {
        "wte": nrm((VOCAB, D)),
        "wpe": nrm((N_CTX, D)),
        # per-layer params stacked on a leading layer axis (static ref[l] in-kernel)
        "ln1_g": jnp.ones((L, 1, D), jnp.float32),
        "ln1_b": jnp.zeros((L, 1, D), jnp.float32),
        "wqkv": wqkv,                                     # bf16, Q-scaled
        "bqkv": bqkv,                                     # f32, Q-scaled
        "wo": nrm((L, N_HEAD, D_HEAD, D)),                # f32: cast-free attention epilogue
        "bo": nrm((L, 1, D)),
        "ln2_g": jnp.ones((L, 1, D), jnp.float32),
        "ln2_b": jnp.zeros((L, 1, D), jnp.float32),
        "w1": nrm((L, D, Dm), jnp.bfloat16),              # MLP.fc1 (stored [in, out])
        "b1": nrm((L, 1, Dm)),
        "w2": nrm((L, Dm, D), jnp.bfloat16),              # MLP.fc2 (stored [in, out])
        "b2": nrm((L, 1, D)),
        "lnf_g": jnp.ones((1, D), jnp.float32),
        "lnf_b": jnp.zeros((1, D), jnp.float32),
        "wu": wu.astype(jnp.bfloat16),                    # unembed, padded to 128 lanes
        "bu": bu,
    }


if __name__ == "__main__":
    root = jax.random.PRNGKey(0)
    kp, kx = jax.random.split(root)
    params = init_params(kp)
    input_ids = jax.random.randint(kx, (BATCH, SEQ), 0, VOCAB, dtype=jnp.int32)

    logits = gpt2_forward(input_ids, params)
    jax.block_until_ready(logits)

    assert logits.shape == (BATCH, SEQ, VOCAB), logits.shape
    assert bool(jnp.all(jnp.isfinite(logits)))

    ref = gpt2_forward_ref(input_ids, params)
    max_err = float(jnp.max(jnp.abs(logits - ref)))
    assert max_err < 2e-2, f"max abs error vs reference: {max_err}"

    print("KERNEL_OK")
</pallas_src>

<mosaic_0001>
module attributes {stable_mosaic.version = 11 : i64} {
  func.func @gpt2_fused_kernel(%arg0: memref<16x32xf32, #tpu.memory_space<vmem>>, %arg1: memref<2x1x32xf32, #tpu.memory_space<vmem>>, %arg2: memref<2x1x32xf32, #tpu.memory_space<vmem>>, %arg3: memref<2x32x96xbf16, #tpu.memory_space<vmem>>, %arg4: memref<2x1x96xf32, #tpu.memory_space<vmem>>, %arg5: memref<2x4x8x32xf32, #tpu.memory_space<vmem>>, %arg6: memref<2x1x32xf32, #tpu.memory_space<vmem>>, %arg7: memref<2x1x32xf32, #tpu.memory_space<vmem>>, %arg8: memref<2x1x32xf32, #tpu.memory_space<vmem>>, %arg9: memref<2x32x128xbf16, #tpu.memory_space<vmem>>, %arg10: memref<2x1x128xf32, #tpu.memory_space<vmem>>, %arg11: memref<2x128x32xbf16, #tpu.memory_space<vmem>>, %arg12: memref<2x1x32xf32, #tpu.memory_space<vmem>>, %arg13: memref<1x32xf32, #tpu.memory_space<vmem>>, %arg14: memref<1x32xf32, #tpu.memory_space<vmem>>, %arg15: memref<32x128xbf16, #tpu.memory_space<vmem>>, %arg16: memref<1x128xf32, #tpu.memory_space<vmem>>, %arg17: memref<16x128xf32, #tpu.memory_space<vmem>>) attributes {dimension_semantics = [], scalar_prefetch = 0 : i64, scratch_operands = 0 : i64, tpu.core_type = #tpu.core_type<tc>} {
    %c0 = arith.constant 0 : index
    %c0_0 = arith.constant 0 : index
    %0 = vector.load %arg0[%c0, %c0_0] : memref<16x32xf32, #tpu.memory_space<vmem>>, vector<16x32xf32>
    %1 = tpu.iota {dimensions = array<i32: 0>} : vector<16x16xi32>
    %2 = tpu.iota {dimensions = array<i32: 1>} : vector<16x16xi32>
    %3 = arith.cmpi sge, %1, %2 : vector<16x16xi32>
    %c8_i32 = arith.constant 8 : i32
    %4 = vector.broadcast %c8_i32 : i32 to vector<16x16xi32>
    %5 = arith.cmpi sge, %1, %4 : vector<16x16xi32>
    %c8_i32_1 = arith.constant 8 : i32
    %6 = vector.broadcast %c8_i32_1 : i32 to vector<16x16xi32>
    %7 = arith.cmpi sge, %2, %6 : vector<16x16xi32>
    %8 = arith.andi %5, %7 : vector<16x16xi1>
    %c8_i32_2 = arith.constant 8 : i32
    %9 = vector.broadcast %c8_i32_2 : i32 to vector<16x16xi32>
    %10 = arith.cmpi slt, %1, %9 : vector<16x16xi32>
    %c8_i32_3 = arith.constant 8 : i32
    %11 = vector.broadcast %c8_i32_3 : i32 to vector<16x16xi32>
    %12 = arith.cmpi slt, %2, %11 : vector<16x16xi32>
    %13 = arith.andi %10, %12 : vector<16x16xi1>
    %14 = arith.ori %8, %13 : vector<16x16xi1>
    %15 = arith.andi %3, %14 : vector<16x16xi1>
    %16 = vector.shape_cast %15 : vector<16x16xi1> to vector<1x16x16xi1>
    %c0_4 = arith.constant 0 : index
    %c0_5 = arith.constant 0 : index
    %c0_6 = arith.constant 0 : index
    %17 = vector.load %arg1[%c0_4, %c0_5, %c0_6] : memref<2x1x32xf32, #tpu.memory_space<vmem>>, vector<1x1x32xf32>
    %18 = vector.shape_cast %17 : vector<1x1x32xf32> to vector<1x32xf32>
    %c0_7 = arith.constant 0 : index
    %c0_8 = arith.constant 0 : index
    %c0_9 = arith.constant 0 : index
    %19 = vector.load %arg2[%c0_7, %c0_8, %c0_9] : memref<2x1x32xf32, #tpu.memory_space<vmem>>, vector<1x1x32xf32>
    %20 = vector.shape_cast %19 : vector<1x1x32xf32> to vector<1x32xf32>
    %cst = arith.constant dense<0.000000e+00> : vector<16xf32>
    %21 = vector.multi_reduction <add>, %0, %cst [1] : vector<16x32xf32> to vector<16xf32>
    %22 = vector.shape_cast %21 : vector<16xf32> to vector<16x1xf32>
    %cst_10 = arith.constant 3.200000e+01 : f32
    %23 = vector.broadcast %cst_10 : f32 to vector<16x1xf32>
    %24 = arith.divf %22, %23 : vector<16x1xf32>
    %25 = vector.broadcast %24 : vector<16x1xf32> to vector<16x32xf32>
    %26 = arith.subf %0, %25 : vector<16x32xf32>
    %27 = vector.broadcast %24 : vector<16x1xf32> to vector<16x32xf32>
    %28 = arith.subf %0, %27 : vector<16x32xf32>
    %29 = arith.mulf %26, %28 : vector<16x32xf32>
    %cst_11 = arith.constant dense<0.000000e+00> : vector<16xf32>
    %30 = vector.multi_reduction <add>, %29, %cst_11 [1] : vector<16x32xf32> to vector<16xf32>
    %31 = vector.shape_cast %30 : vector<16xf32> to vector<16x1xf32>
    %cst_12 = arith.constant 3.200000e+01 : f32
    %32 = vector.broadcast %cst_12 : f32 to vector<16x1xf32>
    %33 = arith.divf %31, %32 : vector<16x1xf32>
    %34 = vector.broadcast %24 : vector<16x1xf32> to vector<16x32xf32>
    %35 = arith.subf %0, %34 : vector<16x32xf32>
    %cst_13 = arith.constant 9.99999974E-6 : f32
    %36 = vector.broadcast %cst_13 : f32 to vector<16x1xf32>
    %37 = arith.addf %33, %36 : vector<16x1xf32>
    %38 = math.rsqrt %37 : vector<16x1xf32>
    %39 = vector.broadcast %38 : vector<16x1xf32> to vector<16x32xf32>
    %40 = arith.mulf %35, %39 : vector<16x32xf32>
    %41 = vector.broadcast %18 : vector<1x32xf32> to vector<16x32xf32>
    %42 = arith.mulf %40, %41 : vector<16x32xf32>
    %43 = vector.broadcast %20 : vector<1x32xf32> to vector<16x32xf32>
    %44 = arith.addf %42, %43 : vector<16x32xf32>
    %45 = arith.truncf %44 : vector<16x32xf32> to vector<16x32xbf16>
    %c0_14 = arith.constant 0 : index
    %c0_15 = arith.constant 0 : index
    %c0_16 = arith.constant 0 : index
    %46 = vector.load %arg3[%c0_14, %c0_15, %c0_16] : memref<2x32x96xbf16, #tpu.memory_space<vmem>>, vector<1x32x96xbf16>
    %47 = vector.shape_cast %46 : vector<1x32x96xbf16> to vector<32x96xbf16>
    %cst_17 = arith.constant dense<0.000000e+00> : vector<16x96xf32>
    %48 = tpu.matmul %45, %47, %cst_17 {dimension_numbers = #tpu.dot_dimension_numbers<[1], [0], [0], [1], [0, 0, 1, 1], [], []>} : vector<16x32xbf16>, vector<32x96xbf16>, vector<16x96xf32> -> vector<16x96xf32>
    %c0_18 = arith.constant 0 : index
    %c0_19 = arith.constant 0 : index
    %c0_20 = arith.constant 0 : index
    %49 = vector.load %arg4[%c0_18, %c0_19, %c0_20] : memref<2x1x96xf32, #tpu.memory_space<vmem>>, vector<1x1x96xf32>
    %50 = vector.shape_cast %49 : vector<1x1x96xf32> to vector<1x96xf32>
    %51 = vector.broadcast %50 : vector<1x96xf32> to vector<16x96xf32>
    %52 = arith.addf %48, %51 : vector<16x96xf32>
    %53 = vector.extract_strided_slice %52 {offsets = [0, 0], sizes = [16, 8], strides = [1, 1]} : vector<16x96xf32> to vector<16x8xf32>
    %54 = vector.extract_strided_slice %52 {offsets = [0, 8], sizes = [16, 8], strides = [1, 1]} : vector<16x96xf32> to vector<16x8xf32>
    %55 = vector.extract_strided_slice %52 {offsets = [0, 16], sizes = [16, 8], strides = [1, 1]} : vector<16x96xf32> to vector<16x8xf32>
    %56 = vector.extract_strided_slice %52 {offsets = [0, 24], sizes = [16, 8], strides = [1, 1]} : vector<16x96xf32> to vector<16x8xf32>
    %57 = vector.shape_cast %53 : vector<16x8xf32> to vector<1x16x8xf32>
    %58 = vector.shape_cast %54 : vector<16x8xf32> to vector<1x16x8xf32>
    %59 = vector.shape_cast %55 : vector<16x8xf32> to vector<1x16x8xf32>
    %60 = vector.shape_cast %56 : vector<16x8xf32> to vector<1x16x8xf32>
    %61 = tpu.concatenate %57, %58, %59, %60 in 0 : vector<1x16x8xf32>, vector<1x16x8xf32>, vector<1x16x8xf32>, vector<1x16x8xf32> -> vector<4x16x8xf32>
    %62 = vector.extract_strided_slice %52 {offsets = [0, 32], sizes = [16, 8], strides = [1, 1]} : vector<16x96xf32> to vector<16x8xf32>
    %63 = vector.extract_strided_slice %52 {offsets = [0, 40], sizes = [16, 8], strides = [1, 1]} : vector<16x96xf32> to vector<16x8xf32>
    %64 = vector.extract_strided_slice %52 {offsets = [0, 48], sizes = [16, 8], strides = [1, 1]} : vector<16x96xf32> to vector<16x8xf32>
    %65 = vector.extract_strided_slice %52 {offsets = [0, 56], sizes = [16, 8], strides = [1, 1]} : vector<16x96xf32> to vector<16x8xf32>
    %66 = vector.shape_cast %62 : vector<16x8xf32> to vector<1x16x8xf32>
    %67 = vector.shape_cast %63 : vector<16x8xf32> to vector<1x16x8xf32>
    %68 = vector.shape_cast %64 : vector<16x8xf32> to vector<1x16x8xf32>
    %69 = vector.shape_cast %65 : vector<16x8xf32> to vector<1x16x8xf32>
    %70 = tpu.concatenate %66, %67, %68, %69 in 0 : vector<1x16x8xf32>, vector<1x16x8xf32>, vector<1x16x8xf32>, vector<1x16x8xf32> -> vector<4x16x8xf32>
    %71 = vector.extract_strided_slice %52 {offsets = [0, 64], sizes = [16, 8], strides = [1, 1]} : vector<16x96xf32> to vector<16x8xf32>
    %72 = vector.extract_strided_slice %52 {offsets = [0, 72], sizes = [16, 8], strides = [1, 1]} : vector<16x96xf32> to vector<16x8xf32>
    %73 = vector.extract_strided_slice %52 {offsets = [0, 80], sizes = [16, 8], strides = [1, 1]} : vector<16x96xf32> to vector<16x8xf32>
    %74 = vector.extract_strided_slice %52 {offsets = [0, 88], sizes = [16, 8], strides = [1, 1]} : vector<16x96xf32> to vector<16x8xf32>
    %75 = vector.shape_cast %71 : vector<16x8xf32> to vector<1x16x8xf32>
    %76 = vector.shape_cast %72 : vector<16x8xf32> to vector<1x16x8xf32>
    %77 = vector.shape_cast %73 : vector<16x8xf32> to vector<1x16x8xf32>
    %78 = vector.shape_cast %74 : vector<16x8xf32> to vector<1x16x8xf32>
    %79 = tpu.concatenate %75, %76, %77, %78 in 0 : vector<1x16x8xf32>, vector<1x16x8xf32>, vector<1x16x8xf32>, vector<1x16x8xf32> -> vector<4x16x8xf32>
    "tpu.trace_start"() <{level = 10 : i32, message = "hqd,hkd->hqk"}> : () -> ()
    %cst_21 = arith.constant dense<0.000000e+00> : vector<4x16x16xf32>
    %80 = tpu.matmul %61, %70, %cst_21 {dimension_numbers = #tpu.dot_dimension_numbers<[2], [2], [1], [1], [0, 0, 0, 1, 1, 1], [0], [0]>} : vector<4x16x8xf32>, vector<4x16x8xf32>, vector<4x16x16xf32> -> vector<4x16x16xf32>
    %cst_22 = arith.constant -1.000000e+05 : f32
    "tpu.trace_stop"() : () -> ()
    %81 = vector.shape_cast %16 : vector<1x16x16xi1> to vector<1x16x16xi1>
    %82 = vector.broadcast %81 : vector<1x16x16xi1> to vector<4x16x16xi1>
    %83 = vector.broadcast %cst_22 : f32 to vector<4x16x16xf32>
    %84 = arith.select %82, %80, %83 : vector<4x16x16xi1>, vector<4x16x16xf32>
    %cst_23 = arith.constant dense<0xFF800000> : vector<4x16xf32>
    %85 = vector.multi_reduction <maximumf>, %84, %cst_23 [2] : vector<4x16x16xf32> to vector<4x16xf32>
    %86 = vector.shape_cast %85 : vector<4x16xf32> to vector<4x16x1xf32>
    %87 = vector.broadcast %86 : vector<4x16x1xf32> to vector<4x16x16xf32>
    %88 = arith.subf %84, %87 : vector<4x16x16xf32>
    %89 = math.exp %88 : vector<4x16x16xf32>
    %cst_24 = arith.constant dense<0.000000e+00> : vector<4x16xf32>
    %90 = vector.multi_reduction <add>, %89, %cst_24 [2] : vector<4x16x16xf32> to vector<4x16xf32>
    %91 = vector.shape_cast %90 : vector<4x16xf32> to vector<4x16x1xf32>
    %92 = tpu.reciprocal %91 {approx = true} : vector<4x16x1xf32> -> vector<4x16x1xf32>
    %93 = vector.broadcast %92 : vector<4x16x1xf32> to vector<4x16x16xf32>
    %94 = arith.mulf %89, %93 : vector<4x16x16xf32>
    "tpu.trace_start"() <{level = 10 : i32, message = "hqk,hkd->hqd"}> : () -> ()
    %cst_25 = arith.constant dense<0.000000e+00> : vector<4x16x8xf32>
    %95 = tpu.matmul %94, %79, %cst_25 {dimension_numbers = #tpu.dot_dimension_numbers<[2], [1], [1], [2], [0, 0, 0, 1, 1, 2], [0], [0]>} : vector<4x16x16xf32>, vector<4x16x8xf32>, vector<4x16x8xf32> -> vector<4x16x8xf32>
    "tpu.trace_stop"() : () -> ()
    %c0_26 = arith.constant 0 : index
    %c0_27 = arith.constant 0 : index
    %c0_28 = arith.constant 0 : index
    %c0_29 = arith.constant 0 : index
    %96 = vector.load %arg5[%c0_26, %c0_27, %c0_28, %c0_29] : memref<2x4x8x32xf32, #tpu.memory_space<vmem>>, vector<1x4x8x32xf32>
    %97 = vector.shape_cast %96 : vector<1x4x8x32xf32> to vector<4x8x32xf32>
    "tpu.trace_start"() <{level = 10 : i32, message = "hrd,hdm->hrm"}> : () -> ()
    %cst_30 = arith.constant dense<0.000000e+00> : vector<4x16x32xf32>
    %98 = tpu.matmul %95, %97, %cst_30 {dimension_numbers = #tpu.dot_dimension_numbers<[2], [1], [1], [2], [0, 0, 0, 1, 1, 2], [0], [0]>} : vector<4x16x8xf32>, vector<4x8x32xf32>, vector<4x16x32xf32> -> vector<4x16x32xf32>
    "tpu.trace_stop"() : () -> ()
    %cst_31 = arith.constant dense<0.000000e+00> : vector<16x32xf32>
    %99 = vector.multi_reduction <add>, %98, %cst_31 [0] : vector<4x16x32xf32> to vector<16x32xf32>
    %c0_32 = arith.constant 0 : index
    %c0_33 = arith.constant 0 : index
    %c0_34 = arith.constant 0 : index
    %100 = vector.load %arg6[%c0_32, %c0_33, %c0_34] : memref<2x1x32xf32, #tpu.memory_space<vmem>>, vector<1x1x32xf32>
    %101 = vector.shape_cast %100 : vector<1x1x32xf32> to vector<1x32xf32>
    %102 = vector.broadcast %101 : vector<1x32xf32> to vector<16x32xf32>
    %103 = arith.addf %99, %102 : vector<16x32xf32>
    %104 = arith.addf %0, %103 : vector<16x32xf32>
    %c0_35 = arith.constant 0 : index
    %c0_36 = arith.constant 0 : index
    %c0_37 = arith.constant 0 : index
    %105 = vector.load %arg7[%c0_35, %c0_36, %c0_37] : memref<2x1x32xf32, #tpu.memory_space<vmem>>, vector<1x1x32xf32>
    %106 = vector.shape_cast %105 : vector<1x1x32xf32> to vector<1x32xf32>
    %c0_38 = arith.constant 0 : index
    %c0_39 = arith.constant 0 : index
    %c0_40 = arith.constant 0 : index
    %107 = vector.load %arg8[%c0_38, %c0_39, %c0_40] : memref<2x1x32xf32, #tpu.memory_space<vmem>>, vector<1x1x32xf32>
    %108 = vector.shape_cast %107 : vector<1x1x32xf32> to vector<1x32xf32>
    %cst_41 = arith.constant dense<0.000000e+00> : vector<16xf32>
    %109 = vector.multi_reduction <add>, %104, %cst_41 [1] : vector<16x32xf32> to vector<16xf32>
    %110 = vector.shape_cast %109 : vector<16xf32> to vector<16x1xf32>
    %cst_42 = arith.constant 3.200000e+01 : f32
    %111 = vector.broadcast %cst_42 : f32 to vector<16x1xf32>
    %112 = arith.divf %110, %111 : vector<16x1xf32>
    %113 = vector.broadcast %112 : vector<16x1xf32> to vector<16x32xf32>
    %114 = arith.subf %104, %113 : vector<16x32xf32>
    %115 = vector.broadcast %112 : vector<16x1xf32> to vector<16x32xf32>
    %116 = arith.subf %104, %115 : vector<16x32xf32>
    %117 = arith.mulf %114, %116 : vector<16x32xf32>
    %cst_43 = arith.constant dense<0.000000e+00> : vector<16xf32>
    %118 = vector.multi_reduction <add>, %117, %cst_43 [1] : vector<16x32xf32> to vector<16xf32>
    %119 = vector.shape_cast %118 : vector<16xf32> to vector<16x1xf32>
    %cst_44 = arith.constant 3.200000e+01 : f32
    %120 = vector.broadcast %cst_44 : f32 to vector<16x1xf32>
    %121 = arith.divf %119, %120 : vector<16x1xf32>
    %122 = vector.broadcast %112 : vector<16x1xf32> to vector<16x32xf32>
    %123 = arith.subf %104, %122 : vector<16x32xf32>
    %cst_45 = arith.constant 9.99999974E-6 : f32
    %124 = vector.broadcast %cst_45 : f32 to vector<16x1xf32>
    %125 = arith.addf %121, %124 : vector<16x1xf32>
    %126 = math.rsqrt %125 : vector<16x1xf32>
    %127 = vector.broadcast %126 : vector<16x1xf32> to vector<16x32xf32>
    %128 = arith.mulf %123, %127 : vector<16x32xf32>
    %129 = vector.broadcast %106 : vector<1x32xf32> to vector<16x32xf32>
    %130 = arith.mulf %128, %129 : vector<16x32xf32>
    %131 = vector.broadcast %108 : vector<1x32xf32> to vector<16x32xf32>
    %132 = arith.addf %130, %131 : vector<16x32xf32>
    %133 = arith.truncf %132 : vector<16x32xf32> to vector<16x32xbf16>
    %c0_46 = arith.constant 0 : index
    %c0_47 = arith.constant 0 : index
    %c0_48 = arith.constant 0 : index
    %134 = vector.load %arg9[%c0_46, %c0_47, %c0_48] : memref<2x32x128xbf16, #tpu.memory_space<vmem>>, vector<1x32x128xbf16>
    %135 = vector.shape_cast %134 : vector<1x32x128xbf16> to vector<32x128xbf16>
    %cst_49 = arith.constant dense<0.000000e+00> : vector<16x128xf32>
    %136 = tpu.matmul %133, %135, %cst_49 {dimension_numbers = #tpu.dot_dimension_numbers<[1], [0], [0], [1], [0, 0, 1, 1], [], []>} : vector<16x32xbf16>, vector<32x128xbf16>, vector<16x128xf32> -> vector<16x128xf32>
    %c0_50 = arith.constant 0 : index
    %c0_51 = arith.constant 0 : index
    %c0_52 = arith.constant 0 : index
    %137 = vector.load %arg10[%c0_50, %c0_51, %c0_52] : memref<2x1x128xf32, #tpu.memory_space<vmem>>, vector<1x1x128xf32>
    %138 = vector.shape_cast %137 : vector<1x1x128xf32> to vector<1x128xf32>
    %139 = vector.broadcast %138 : vector<1x128xf32> to vector<16x128xf32>
    %140 = arith.addf %136, %139 : vector<16x128xf32>
    %cst_53 = arith.constant 5.000000e-01 : f32
    %141 = vector.broadcast %cst_53 : f32 to vector<16x128xf32>
    %142 = arith.mulf %141, %140 : vector<16x128xf32>
    %cst_54 = arith.constant 2.000000e+00 : f32
    %143 = math.sqrt %cst_54 : f32
    %144 = vector.broadcast %143 : f32 to vector<16x128xf32>
    %145 = arith.divf %140, %144 : vector<16x128xf32>
    %146 = math.erf %145 : vector<16x128xf32>
    %cst_55 = arith.constant 1.000000e+00 : f32
    %147 = vector.broadcast %cst_55 : f32 to vector<16x128xf32>
    %148 = arith.addf %147, %146 : vector<16x128xf32>
    %149 = arith.mulf %142, %148 : vector<16x128xf32>
    %150 = arith.truncf %149 : vector<16x128xf32> to vector<16x128xbf16>
    %c0_56 = arith.constant 0 : index
    %c0_57 = arith.constant 0 : index
    %c0_58 = arith.constant 0 : index
    %151 = vector.load %arg11[%c0_56, %c0_57, %c0_58] : memref<2x128x32xbf16, #tpu.memory_space<vmem>>, vector<1x128x32xbf16>
    %152 = vector.shape_cast %151 : vector<1x128x32xbf16> to vector<128x32xbf16>
    %cst_59 = arith.constant dense<0.000000e+00> : vector<16x32xf32>
    %153 = tpu.matmul %150, %152, %cst_59 {dimension_numbers = #tpu.dot_dimension_numbers<[1], [0], [0], [1], [0, 0, 1, 1], [], []>} : vector<16x128xbf16>, vector<128x32xbf16>, vector<16x32xf32> -> vector<16x32xf32>
    %c0_60 = arith.constant 0 : index
    %c0_61 = arith.constant 0 : index
    %c0_62 = arith.constant 0 : index
    %154 = vector.load %arg12[%c0_60, %c0_61, %c0_62] : memref<2x1x32xf32, #tpu.memory_space<vmem>>, vector<1x1x32xf32>
    %155 = vector.shape_cast %154 : vector<1x1x32xf32> to vector<1x32xf32>
    %156 = vector.broadcast %155 : vector<1x32xf32> to vector<16x32xf32>
    %157 = arith.addf %153, %156 : vector<16x32xf32>
    %158 = arith.addf %104, %157 : vector<16x32xf32>
    %c1 = arith.constant 1 : index
    %c0_63 = arith.constant 0 : index
    %c0_64 = arith.constant 0 : index
    %159 = vector.load %arg1[%c1, %c0_63, %c0_64] : memref<2x1x32xf32, #tpu.memory_space<vmem>>, vector<1x1x32xf32>
    %160 = vector.shape_cast %159 : vector<1x1x32xf32> to vector<1x32xf32>
    %c1_65 = arith.constant 1 : index
    %c0_66 = arith.constant 0 : index
    %c0_67 = arith.constant 0 : index
    %161 = vector.load %arg2[%c1_65, %c0_66, %c0_67] : memref<2x1x32xf32, #tpu.memory_space<vmem>>, vector<1x1x32xf32>
    %162 = vector.shape_cast %161 : vector<1x1x32xf32> to vector<1x32xf32>
    %cst_68 = arith.constant dense<0.000000e+00> : vector<16xf32>
    %163 = vector.multi_reduction <add>, %158, %cst_68 [1] : vector<16x32xf32> to vector<16xf32>
    %164 = vector.shape_cast %163 : vector<16xf32> to vector<16x1xf32>
    %cst_69 = arith.constant 3.200000e+01 : f32
    %165 = vector.broadcast %cst_69 : f32 to vector<16x1xf32>
    %166 = arith.divf %164, %165 : vector<16x1xf32>
    %167 = vector.broadcast %166 : vector<16x1xf32> to vector<16x32xf32>
    %168 = arith.subf %158, %167 : vector<16x32xf32>
    %169 = vector.broadcast %166 : vector<16x1xf32> to vector<16x32xf32>
    %170 = arith.subf %158, %169 : vector<16x32xf32>
    %171 = arith.mulf %168, %170 : vector<16x32xf32>
    %cst_70 = arith.constant dense<0.000000e+00> : vector<16xf32>
    %172 = vector.multi_reduction <add>, %171, %cst_70 [1] : vector<16x32xf32> to vector<16xf32>
    %173 = vector.shape_cast %172 : vector<16xf32> to vector<16x1xf32>
    %cst_71 = arith.constant 3.200000e+01 : f32
    %174 = vector.broadcast %cst_71 : f32 to vector<16x1xf32>
    %175 = arith.divf %173, %174 : vector<16x1xf32>
    %176 = vector.broadcast %166 : vector<16x1xf32> to vector<16x32xf32>
    %177 = arith.subf %158, %176 : vector<16x32xf32>
    %cst_72 = arith.constant 9.99999974E-6 : f32
    %178 = vector.broadcast %cst_72 : f32 to vector<16x1xf32>
    %179 = arith.addf %175, %178 : vector<16x1xf32>
    %180 = math.rsqrt %179 : vector<16x1xf32>
    %181 = vector.broadcast %180 : vector<16x1xf32> to vector<16x32xf32>
    %182 = arith.mulf %177, %181 : vector<16x32xf32>
    %183 = vector.broadcast %160 : vector<1x32xf32> to vector<16x32xf32>
    %184 = arith.mulf %182, %183 : vector<16x32xf32>
    %185 = vector.broadcast %162 : vector<1x32xf32> to vector<16x32xf32>
    %186 = arith.addf %184, %185 : vector<16x32xf32>
    %187 = arith.truncf %186 : vector<16x32xf32> to vector<16x32xbf16>
    %c1_73 = arith.constant 1 : index
    %c0_74 = arith.constant 0 : index
    %c0_75 = arith.constant 0 : index
    %188 = vector.load %arg3[%c1_73, %c0_74, %c0_75] : memref<2x32x96xbf16, #tpu.memory_space<vmem>>, vector<1x32x96xbf16>
    %189 = vector.shape_cast %188 : vector<1x32x96xbf16> to vector<32x96xbf16>
    %cst_76 = arith.constant dense<0.000000e+00> : vector<16x96xf32>
    %190 = tpu.matmul %187, %189, %cst_76 {dimension_numbers = #tpu.dot_dimension_numbers<[1], [0], [0], [1], [0, 0, 1, 1], [], []>} : vector<16x32xbf16>, vector<32x96xbf16>, vector<16x96xf32> -> vector<16x96xf32>
    %c1_77 = arith.constant 1 : index
    %c0_78 = arith.constant 0 : index
    %c0_79 = arith.constant 0 : index
    %191 = vector.load %arg4[%c1_77, %c0_78, %c0_79] : memref<2x1x96xf32, #tpu.memory_space<vmem>>, vector<1x1x96xf32>
    %192 = vector.shape_cast %191 : vector<1x1x96xf32> to vector<1x96xf32>
    %193 = vector.broadcast %192 : vector<1x96xf32> to vector<16x96xf32>
    %194 = arith.addf %190, %193 : vector<16x96xf32>
    %195 = vector.extract_strided_slice %194 {offsets = [0, 0], sizes = [16, 8], strides = [1, 1]} : vector<16x96xf32> to vector<16x8xf32>
    %196 = vector.extract_strided_slice %194 {offsets = [0, 8], sizes = [16, 8], strides = [1, 1]} : vector<16x96xf32> to vector<16x8xf32>
    %197 = vector.extract_strided_slice %194 {offsets = [0, 16], sizes = [16, 8], strides = [1, 1]} : vector<16x96xf32> to vector<16x8xf32>
    %198 = vector.extract_strided_slice %194 {offsets = [0, 24], sizes = [16, 8], strides = [1, 1]} : vector<16x96xf32> to vector<16x8xf32>
    %199 = vector.shape_cast %195 : vector<16x8xf32> to vector<1x16x8xf32>
    %200 = vector.shape_cast %196 : vector<16x8xf32> to vector<1x16x8xf32>
    %201 = vector.shape_cast %197 : vector<16x8xf32> to vector<1x16x8xf32>
    %202 = vector.shape_cast %198 : vector<16x8xf32> to vector<1x16x8xf32>
    %203 = tpu.concatenate %199, %200, %201, %202 in 0 : vector<1x16x8xf32>, vector<1x16x8xf32>, vector<1x16x8xf32>, vector<1x16x8xf32> -> vector<4x16x8xf32>
    %204 = vector.extract_strided_slice %194 {offsets = [0, 32], sizes = [16, 8], strides = [1, 1]} : vector<16x96xf32> to vector<16x8xf32>
    %205 = vector.extract_strided_slice %194 {offsets = [0, 40], sizes = [16, 8], strides = [1, 1]} : vector<16x96xf32> to vector<16x8xf32>
    %206 = vector.extract_strided_slice %194 {offsets = [0, 48], sizes = [16, 8], strides = [1, 1]} : vector<16x96xf32> to vector<16x8xf32>
    %207 = vector.extract_strided_slice %194 {offsets = [0, 56], sizes = [16, 8], strides = [1, 1]} : vector<16x96xf32> to vector<16x8xf32>
    %208 = vector.shape_cast %204 : vector<16x8xf32> to vector<1x16x8xf32>
    %209 = vector.shape_cast %205 : vector<16x8xf32> to vector<1x16x8xf32>
    %210 = vector.shape_cast %206 : vector<16x8xf32> to vector<1x16x8xf32>
    %211 = vector.shape_cast %207 : vector<16x8xf32> to vector<1x16x8xf32>
    %212 = tpu.concatenate %208, %209, %210, %211 in 0 : vector<1x16x8xf32>, vector<1x16x8xf32>, vector<1x16x8xf32>, vector<1x16x8xf32> -> vector<4x16x8xf32>
    %213 = vector.extract_strided_slice %194 {offsets = [0, 64], sizes = [16, 8], strides = [1, 1]} : vector<16x96xf32> to vector<16x8xf32>
    %214 = vector.extract_strided_slice %194 {offsets = [0, 72], sizes = [16, 8], strides = [1, 1]} : vector<16x96xf32> to vector<16x8xf32>
    %215 = vector.extract_strided_slice %194 {offsets = [0, 80], sizes = [16, 8], strides = [1, 1]} : vector<16x96xf32> to vector<16x8xf32>
    %216 = vector.extract_strided_slice %194 {offsets = [0, 88], sizes = [16, 8], strides = [1, 1]} : vector<16x96xf32> to vector<16x8xf32>
    %217 = vector.shape_cast %213 : vector<16x8xf32> to vector<1x16x8xf32>
    %218 = vector.shape_cast %214 : vector<16x8xf32> to vector<1x16x8xf32>
    %219 = vector.shape_cast %215 : vector<16x8xf32> to vector<1x16x8xf32>
    %220 = vector.shape_cast %216 : vector<16x8xf32> to vector<1x16x8xf32>
    %221 = tpu.concatenate %217, %218, %219, %220 in 0 : vector<1x16x8xf32>, vector<1x16x8xf32>, vector<1x16x8xf32>, vector<1x16x8xf32> -> vector<4x16x8xf32>
    "tpu.trace_start"() <{level = 10 : i32, message = "hqd,hkd->hqk"}> : () -> ()
    %cst_80 = arith.constant dense<0.000000e+00> : vector<4x16x16xf32>
    %222 = tpu.matmul %203, %212, %cst_80 {dimension_numbers = #tpu.dot_dimension_numbers<[2], [2], [1], [1], [0, 0, 0, 1, 1, 1], [0], [0]>} : vector<4x16x8xf32>, vector<4x16x8xf32>, vector<4x16x16xf32> -> vector<4x16x16xf32>
    %cst_81 = arith.constant -1.000000e+05 : f32
    "tpu.trace_stop"() : () -> ()
    %223 = vector.shape_cast %16 : vector<1x16x16xi1> to vector<1x16x16xi1>
    %224 = vector.broadcast %223 : vector<1x16x16xi1> to vector<4x16x16xi1>
    %225 = vector.broadcast %cst_81 : f32 to vector<4x16x16xf32>
    %226 = arith.select %224, %222, %225 : vector<4x16x16xi1>, vector<4x16x16xf32>
    %cst_82 = arith.constant dense<0xFF800000> : vector<4x16xf32>
    %227 = vector.multi_reduction <maximumf>, %226, %cst_82 [2] : vector<4x16x16xf32> to vector<4x16xf32>
    %228 = vector.shape_cast %227 : vector<4x16xf32> to vector<4x16x1xf32>
    %229 = vector.broadcast %228 : vector<4x16x1xf32> to vector<4x16x16xf32>
    %230 = arith.subf %226, %229 : vector<4x16x16xf32>
    %231 = math.exp %230 : vector<4x16x16xf32>
    %cst_83 = arith.constant dense<0.000000e+00> : vector<4x16xf32>
    %232 = vector.multi_reduction <add>, %231, %cst_83 [2] : vector<4x16x16xf32> to vector<4x16xf32>
    %233 = vector.shape_cast %232 : vector<4x16xf32> to vector<4x16x1xf32>
    %234 = tpu.reciprocal %233 {approx = true} : vector<4x16x1xf32> -> vector<4x16x1xf32>
    %235 = vector.broadcast %234 : vector<4x16x1xf32> to vector<4x16x16xf32>
    %236 = arith.mulf %231, %235 : vector<4x16x16xf32>
    "tpu.trace_start"() <{level = 10 : i32, message = "hqk,hkd->hqd"}> : () -> ()
    %cst_84 = arith.constant dense<0.000000e+00> : vector<4x16x8xf32>
    %237 = tpu.matmul %236, %221, %cst_84 {dimension_numbers = #tpu.dot_dimension_numbers<[2], [1], [1], [2], [0, 0, 0, 1, 1, 2], [0], [0]>} : vector<4x16x16xf32>, vector<4x16x8xf32>, vector<4x16x8xf32> -> vector<4x16x8xf32>
    "tpu.trace_stop"() : () -> ()
    %c1_85 = arith.constant 1 : index
    %c0_86 = arith.constant 0 : index
    %c0_87 = arith.constant 0 : index
    %c0_88 = arith.constant 0 : index
    %238 = vector.load %arg5[%c1_85, %c0_86, %c0_87, %c0_88] : memref<2x4x8x32xf32, #tpu.memory_space<vmem>>, vector<1x4x8x32xf32>
    %239 = vector.shape_cast %238 : vector<1x4x8x32xf32> to vector<4x8x32xf32>
    "tpu.trace_start"() <{level = 10 : i32, message = "hrd,hdm->hrm"}> : () -> ()
    %cst_89 = arith.constant dense<0.000000e+00> : vector<4x16x32xf32>
    %240 = tpu.matmul %237, %239, %cst_89 {dimension_numbers = #tpu.dot_dimension_numbers<[2], [1], [1], [2], [0, 0, 0, 1, 1, 2], [0], [0]>} : vector<4x16x8xf32>, vector<4x8x32xf32>, vector<4x16x32xf32> -> vector<4x16x32xf32>
    "tpu.trace_stop"() : () -> ()
    %cst_90 = arith.constant dense<0.000000e+00> : vector<16x32xf32>
    %241 = vector.multi_reduction <add>, %240, %cst_90 [0] : vector<4x16x32xf32> to vector<16x32xf32>
    %c1_91 = arith.constant 1 : index
    %c0_92 = arith.constant 0 : index
    %c0_93 = arith.constant 0 : index
    %242 = vector.load %arg6[%c1_91, %c0_92, %c0_93] : memref<2x1x32xf32, #tpu.memory_space<vmem>>, vector<1x1x32xf32>
    %243 = vector.shape_cast %242 : vector<1x1x32xf32> to vector<1x32xf32>
    %244 = vector.broadcast %243 : vector<1x32xf32> to vector<16x32xf32>
    %245 = arith.addf %241, %244 : vector<16x32xf32>
    %246 = arith.addf %158, %245 : vector<16x32xf32>
    %c1_94 = arith.constant 1 : index
    %c0_95 = arith.constant 0 : index
    %c0_96 = arith.constant 0 : index
    %247 = vector.load %arg7[%c1_94, %c0_95, %c0_96] : memref<2x1x32xf32, #tpu.memory_space<vmem>>, vector<1x1x32xf32>
    %248 = vector.shape_cast %247 : vector<1x1x32xf32> to vector<1x32xf32>
    %c1_97 = arith.constant 1 : index
    %c0_98 = arith.constant 0 : index
    %c0_99 = arith.constant 0 : index
    %249 = vector.load %arg8[%c1_97, %c0_98, %c0_99] : memref<2x1x32xf32, #tpu.memory_space<vmem>>, vector<1x1x32xf32>
    %250 = vector.shape_cast %249 : vector<1x1x32xf32> to vector<1x32xf32>
    %cst_100 = arith.constant dense<0.000000e+00> : vector<16xf32>
    %251 = vector.multi_reduction <add>, %246, %cst_100 [1] : vector<16x32xf32> to vector<16xf32>
    %252 = vector.shape_cast %251 : vector<16xf32> to vector<16x1xf32>
    %cst_101 = arith.constant 3.200000e+01 : f32
    %253 = vector.broadcast %cst_101 : f32 to vector<16x1xf32>
    %254 = arith.divf %252, %253 : vector<16x1xf32>
    %255 = vector.broadcast %254 : vector<16x1xf32> to vector<16x32xf32>
    %256 = arith.subf %246, %255 : vector<16x32xf32>
    %257 = vector.broadcast %254 : vector<16x1xf32> to vector<16x32xf32>
    %258 = arith.subf %246, %257 : vector<16x32xf32>
    %259 = arith.mulf %256, %258 : vector<16x32xf32>
    %cst_102 = arith.constant dense<0.000000e+00> : vector<16xf32>
    %260 = vector.multi_reduction <add>, %259, %cst_102 [1] : vector<16x32xf32> to vector<16xf32>
    %261 = vector.shape_cast %260 : vector<16xf32> to vector<16x1xf32>
    %cst_103 = arith.constant 3.200000e+01 : f32
    %262 = vector.broadcast %cst_103 : f32 to vector<16x1xf32>
    %263 = arith.divf %261, %262 : vector<16x1xf32>
    %264 = vector.broadcast %254 : vector<16x1xf32> to vector<16x32xf32>
    %265 = arith.subf %246, %264 : vector<16x32xf32>
    %cst_104 = arith.constant 9.99999974E-6 : f32
    %266 = vector.broadcast %cst_104 : f32 to vector<16x1xf32>
    %267 = arith.addf %263, %266 : vector<16x1xf32>
    %268 = math.rsqrt %267 : vector<16x1xf32>
    %269 = vector.broadcast %268 : vector<16x1xf32> to vector<16x32xf32>
    %270 = arith.mulf %265, %269 : vector<16x32xf32>
    %271 = vector.broadcast %248 : vector<1x32xf32> to vector<16x32xf32>
    %272 = arith.mulf %270, %271 : vector<16x32xf32>
    %273 = vector.broadcast %250 : vector<1x32xf32> to vector<16x32xf32>
    %274 = arith.addf %272, %273 : vector<16x32xf32>
    %275 = arith.truncf %274 : vector<16x32xf32> to vector<16x32xbf16>
    %c1_105 = arith.constant 1 : index
    %c0_106 = arith.constant 0 : index
    %c0_107 = arith.constant 0 : index
    %276 = vector.load %arg9[%c1_105, %c0_106, %c0_107] : memref<2x32x128xbf16, #tpu.memory_space<vmem>>, vector<1x32x128xbf16>
    %277 = vector.shape_cast %276 : vector<1x32x128xbf16> to vector<32x128xbf16>
    %cst_108 = arith.constant dense<0.000000e+00> : vector<16x128xf32>
    %278 = tpu.matmul %275, %277, %cst_108 {dimension_numbers = #tpu.dot_dimension_numbers<[1], [0], [0], [1], [0, 0, 1, 1], [], []>} : vector<16x32xbf16>, vector<32x128xbf16>, vector<16x128xf32> -> vector<16x128xf32>
    %c1_109 = arith.constant 1 : index
    %c0_110 = arith.constant 0 : index
    %c0_111 = arith.constant 0 : index
    %279 = vector.load %arg10[%c1_109, %c0_110, %c0_111] : memref<2x1x128xf32, #tpu.memory_space<vmem>>, vector<1x1x128xf32>
    %280 = vector.shape_cast %279 : vector<1x1x128xf32> to vector<1x128xf32>
    %281 = vector.broadcast %280 : vector<1x128xf32> to vector<16x128xf32>
    %282 = arith.addf %278, %281 : vector<16x128xf32>
    %cst_112 = arith.constant 5.000000e-01 : f32
    %283 = vector.broadcast %cst_112 : f32 to vector<16x128xf32>
    %284 = arith.mulf %283, %282 : vector<16x128xf32>
    %cst_113 = arith.constant 2.000000e+00 : f32
    %285 = math.sqrt %cst_113 : f32
    %286 = vector.broadcast %285 : f32 to vector<16x128xf32>
    %287 = arith.divf %282, %286 : vector<16x128xf32>
    %288 = math.erf %287 : vector<16x128xf32>
    %cst_114 = arith.constant 1.000000e+00 : f32
    %289 = vector.broadcast %cst_114 : f32 to vector<16x128xf32>
    %290 = arith.addf %289, %288 : vector<16x128xf32>
    %291 = arith.mulf %284, %290 : vector<16x128xf32>
    %292 = arith.truncf %291 : vector<16x128xf32> to vector<16x128xbf16>
    %c1_115 = arith.constant 1 : index
    %c0_116 = arith.constant 0 : index
    %c0_117 = arith.constant 0 : index
    %293 = vector.load %arg11[%c1_115, %c0_116, %c0_117] : memref<2x128x32xbf16, #tpu.memory_space<vmem>>, vector<1x128x32xbf16>
    %294 = vector.shape_cast %293 : vector<1x128x32xbf16> to vector<128x32xbf16>
    %cst_118 = arith.constant dense<0.000000e+00> : vector<16x32xf32>
    %295 = tpu.matmul %292, %294, %cst_118 {dimension_numbers = #tpu.dot_dimension_numbers<[1], [0], [0], [1], [0, 0, 1, 1], [], []>} : vector<16x128xbf16>, vector<128x32xbf16>, vector<16x32xf32> -> vector<16x32xf32>
    %c1_119 = arith.constant 1 : index
    %c0_120 = arith.constant 0 : index
    %c0_121 = arith.constant 0 : index
    %296 = vector.load %arg12[%c1_119, %c0_120, %c0_121] : memref<2x1x32xf32, #tpu.memory_space<vmem>>, vector<1x1x32xf32>
    %297 = vector.shape_cast %296 : vector<1x1x32xf32> to vector<1x32xf32>
    %298 = vector.broadcast %297 : vector<1x32xf32> to vector<16x32xf32>
    %299 = arith.addf %295, %298 : vector<16x32xf32>
    %300 = arith.addf %246, %299 : vector<16x32xf32>
    %c0_122 = arith.constant 0 : index
    %c0_123 = arith.constant 0 : index
    %301 = vector.load %arg13[%c0_122, %c0_123] : memref<1x32xf32, #tpu.memory_space<vmem>>, vector<1x32xf32>
    %c0_124 = arith.constant 0 : index
    %c0_125 = arith.constant 0 : index
    %302 = vector.load %arg14[%c0_124, %c0_125] : memref<1x32xf32, #tpu.memory_space<vmem>>, vector<1x32xf32>
    %cst_126 = arith.constant dense<0.000000e+00> : vector<16xf32>
    %303 = vector.multi_reduction <add>, %300, %cst_126 [1] : vector<16x32xf32> to vector<16xf32>
    %304 = vector.shape_cast %303 : vector<16xf32> to vector<16x1xf32>
    %cst_127 = arith.constant 3.200000e+01 : f32
    %305 = vector.broadcast %cst_127 : f32 to vector<16x1xf32>
    %306 = arith.divf %304, %305 : vector<16x1xf32>
    %307 = vector.broadcast %306 : vector<16x1xf32> to vector<16x32xf32>
    %308 = arith.subf %300, %307 : vector<16x32xf32>
    %309 = vector.broadcast %306 : vector<16x1xf32> to vector<16x32xf32>
    %310 = arith.subf %300, %309 : vector<16x32xf32>
    %311 = arith.mulf %308, %310 : vector<16x32xf32>
    %cst_128 = arith.constant dense<0.000000e+00> : vector<16xf32>
    %312 = vector.multi_reduction <add>, %311, %cst_128 [1] : vector<16x32xf32> to vector<16xf32>
    %313 = vector.shape_cast %312 : vector<16xf32> to vector<16x1xf32>
    %cst_129 = arith.constant 3.200000e+01 : f32
    %314 = vector.broadcast %cst_129 : f32 to vector<16x1xf32>
    %315 = arith.divf %313, %314 : vector<16x1xf32>
    %316 = vector.broadcast %306 : vector<16x1xf32> to vector<16x32xf32>
    %317 = arith.subf %300, %316 : vector<16x32xf32>
    %cst_130 = arith.constant 9.99999974E-6 : f32
    %318 = vector.broadcast %cst_130 : f32 to vector<16x1xf32>
    %319 = arith.addf %315, %318 : vector<16x1xf32>
    %320 = math.rsqrt %319 : vector<16x1xf32>
    %321 = vector.broadcast %320 : vector<16x1xf32> to vector<16x32xf32>
    %322 = arith.mulf %317, %321 : vector<16x32xf32>
    %323 = vector.broadcast %301 : vector<1x32xf32> to vector<16x32xf32>
    %324 = arith.mulf %322, %323 : vector<16x32xf32>
    %325 = vector.broadcast %302 : vector<1x32xf32> to vector<16x32xf32>
    %326 = arith.addf %324, %325 : vector<16x32xf32>
    %327 = arith.truncf %326 : vector<16x32xf32> to vector<16x32xbf16>
    %c0_131 = arith.constant 0 : index
    %c0_132 = arith.constant 0 : index
    %328 = vector.load %arg15[%c0_131, %c0_132] : memref<32x128xbf16, #tpu.memory_space<vmem>>, vector<32x128xbf16>
    %cst_133 = arith.constant dense<0.000000e+00> : vector<16x128xf32>
    %329 = tpu.matmul %327, %328, %cst_133 {dimension_numbers = #tpu.dot_dimension_numbers<[1], [0], [0], [1], [0, 0, 1, 1], [], []>} : vector<16x32xbf16>, vector<32x128xbf16>, vector<16x128xf32> -> vector<16x128xf32>
    %c0_134 = arith.constant 0 : index
    %c0_135 = arith.constant 0 : index
    %330 = vector.load %arg16[%c0_134, %c0_135] : memref<1x128xf32, #tpu.memory_space<vmem>>, vector<1x128xf32>
    %331 = vector.broadcast %330 : vector<1x128xf32> to vector<16x128xf32>
    %332 = arith.addf %329, %331 : vector<16x128xf32>
    %c0_136 = arith.constant 0 : index
    %c0_137 = arith.constant 0 : index
    %333 = vector.load %arg17[%c0_136, %c0_137] : memref<16x128xf32, #tpu.memory_space<vmem>>, vector<16x128xf32>
    tpu.vector_store %arg17[%c0_136, %c0_137], %332 {strides = array<i32>} : memref<16x128xf32, #tpu.memory_space<vmem>>, vector<16x128xf32>,
    return
  }
}

</mosaic_0001>

<bundles_post_ra>
// kernel: tpu_custom_call.1
= control target key start
LH: loop header
LB: loop body
LE: loop exit
PB: predicated region body
PF: predicated region fallthrough
CT: control target
= control target key end

     0   :  { %s4873_s0 = inlined_call_operand.vmem [shape: f32[16,32], index: 0, kind: input, shape index: {}]   ;;  %s4874_s1 = inlined_call_operand.vmem [shape: f32[2,1,32], index: 1, kind: input, shape index: {}]   ;;  %s4875_s2 = inlined_call_operand.vmem [shape: f32[2,1,32], index: 2, kind: input, shape index: {}]   ;;  %s4876_s3 = inlined_call_operand.vmem [shape: bf16[2,32,96], index: 3, kind: input, shape index: {}]   ;;  %s4877_s4 = inlined_call_operand.vmem [shape: f32[2,1,96], index: 4, kind: input, shape index: {}]   ;;  %s4878_s5 = inlined_call_operand.vmem [shape: f32[2,4,8,32], index: 5, kind: input, shape index: {}]   ;;  %s4879_s6 = inlined_call_operand.vmem [shape: f32[2,1,32], index: 6, kind: input, shape index: {}]   ;;  %s4880_s7 = inlined_call_operand.hbm [shape: f32[2,1,32], index: 7, kind: input, shape index: {}]   ;;  %s4881_s8 = inlined_call_operand.hbm [shape: f32[2,1,32], index: 8, kind: input, shape index: {}]   ;;  %s4882_s9 = inlined_call_operand.vmem [shape: bf16[2,32,128], index: 9, kind: input, shape index: {}]   ;;  %s4883_s10 = inlined_call_operand.hbm [shape: f32[2,1,128], index: 10, kind: input, shape index: {}]   ;;  %s4884_s11 = inlined_call_operand.vmem [shape: bf16[2,128,32], index: 11, kind: input, shape index: {}]   ;;  %s4885_s12 = inlined_call_operand.vmem [shape: f32[2,1,32], index: 12, kind: input, shape index: {}]   ;;  %s4886_s13 = inlined_call_operand.vmem [shape: f32[1,32], index: 13, kind: input, shape index: {}]   ;;  %s4887_s14 = inlined_call_operand.vmem [shape: f32[1,32], index: 14, kind: input, shape index: {}]   ;;  %s4888_s15 = inlined_call_operand.vmem [shape: bf16[32,128], index: 15, kind: input, shape index: {}]   ;;  %s4889_s16 = inlined_call_operand.vmem [shape: f32[1,128], index: 16, kind: input, shape index: {}]   ;;  %s4890_s17 = inlined_call_operand.hbm [shape: f32[16,128], index: 17, kind: output, shape index: {}]  }
   0x1   :  { %4893 = sst [smem:[#allocation12_spill]] %s4873_s0 }
   0x2   :  { %4894 = sst [smem:[#allocation13_spill]] %s4874_s1 }
   0x3   :  { %22 = vsyncpa [#allocation3], 0 }
   0x4   :  { %23 = vsyncpa [#allocation6], 0 }
   0x5   :  { %24 = vsyncpa [#allocation4], 0  ;;  %s4178_s24 = smov [#allocation5]   ;;  %s4179_s26 = smov [#allocation2]  }
   0x6   :  { %s56_s25 = sshll.u32 %s4178_s24, 4  ;;  %s44_s27 = sshll.u32 %s4179_s26, 4  ;;  %s57_s25 = int_to_ptr.vmem [resolvable:$true] %s56_s25  ;;  %s4283_s27 = int_to_ptr.vmem [resolvable:$true] %s44_s27 }
   0x7   :  { %s4084_s0 = scalar_lea.hbm %s4881_s8, 32 }
   0x8   :  { %p4085_p0 = scmp.ne.s32.totalorder %s4881_s8, %s4084_s0  ;;  %p4088_p1 = scmp.lt.u32.totalorder %s4084_s0, %s4881_s8 }
   0xa   :  { %p4090_p2 = pnand %p4088_p1, %p4085_p0 }
   0xc   :  { %4093 = shalt.err (!%p4090_p2)
}
   0xd   :  { %s4094_s20 = scalar_lea.vmem %s57_s25, 32  ;;  %p4099_p4 = scmp.lt.s32.totalorder %s57_s25, %s57_s25 }
   0xe   :  { %p4095_p3 = scmp.ne.s32.totalorder %s57_s25, %s4094_s20  ;;  %p4100_p5 = scmp.lt.s32.totalorder %s4094_s20, %s4094_s20 }
  0x10   :  { %p4101_p6 = por %p4100_p5, %p4099_p4 }
  0x12   :  { %p4102_p7 = pnand %p4101_p6, %p4095_p3 }
  0x14   :  { %4105 = shalt.err (!%p4102_p7)
}
  0x15   :  { %s4180_s21 = smov 16   ;;  %s4181_s22 = smov 1  }
  0x16   :  { %62 = dma.hbm_to_vmem [thread:$0]  %s4881_s8, 32, %s57_s25, [#allocation6], %s4180_s21, %s4180_s21, %s4181_s22  }
  0x17   :  { %s4106_s29 = scalar_lea.hbm %s4880_s7, 32 }
  0x18   :  { %p4107_p8 = scmp.ne.s32.totalorder %s4880_s7, %s4106_s29  ;;  %p4110_p9 = scmp.lt.u32.totalorder %s4106_s29, %s4880_s7 }
  0x1a   :  { %p4112_p10 = pnand %p4110_p9, %p4107_p8 }
  0x1c   :  { %4115 = shalt.err (!%p4112_p10)
}
  0x1d   :  { %s4116_s1 = scalar_lea.vmem %s4283_s27, 32  ;;  %p4121_p12 = scmp.lt.s32.totalorder %s4283_s27, %s4283_s27 }
  0x1e   :  { %p4117_p11 = scmp.ne.s32.totalorder %s4283_s27, %s4116_s1  ;;  %p4122_p13 = scmp.lt.s32.totalorder %s4116_s1, %s4116_s1 }
  0x20   :  { %p4123_p0 = por %p4122_p13, %p4121_p12 }
  0x22   :  { %p4124_p1 = pnand %p4123_p0, %p4117_p11 }
  0x24   :  { %4127 = shalt.err (!%p4124_p1)
}
  0x25   :  { %50 = dma.hbm_to_vmem [thread:$0]  %s4880_s7, 32, %s4283_s27, [#allocation3], %s4180_s21, %s4180_s21, %s4181_s22  }
  0x26   :  { %s4182_s20 = smov [#allocation7]   ;;  %s4128_s28 = scalar_lea.hbm %s4883_s10, 32 }
  0x27   :  { %s70_s23 = sshll.u32 %s4182_s20, 4  ;;  %p4129_p2 = scmp.ne.s32.totalorder %s4883_s10, %s4128_s28  ;;  %s71_s23 = int_to_ptr.vmem [resolvable:$true] %s70_s23 }
  0x28   :  { %p4132_p3 = scmp.lt.u32.totalorder %s4128_s28, %s4883_s10 }
  0x2a   :  { %p4134_p4 = pnand %p4132_p3, %p4129_p2 }
  0x2c   :  { %4137 = shalt.err (!%p4134_p4)
}
  0x2d   :  { %s4138_s19 = scalar_lea.vmem %s71_s23, 32  ;;  %p4143_p6 = scmp.lt.s32.totalorder %s71_s23, %s71_s23 }
  0x2e   :  { %p4139_p5 = scmp.ne.s32.totalorder %s71_s23, %s4138_s19  ;;  %p4144_p7 = scmp.lt.s32.totalorder %s4138_s19, %s4138_s19 }
  0x30   :  { %p4145_p8 = por %p4144_p7, %p4143_p6 }
  0x32   :  { %p4146_p9 = pnand %p4145_p8, %p4139_p5 }
  0x34   :  { %4149 = shalt.err (!%p4146_p9)
}
  0x35   :  { %76 = dma.hbm_to_vmem [thread:$0]  %s4883_s10, 32, %s71_s23, [#allocation6], %s4180_s21, %s4180_s21, %s4181_s22  }
  0x36   :  { %4172 = dma.done.wait [#allocation3], 32  }
  0x37   :  { %4173 = vsyncadd [#allocation3], 4294967264 }
  0x38   :  { %4174 = dma.done.wait [#allocation6], 64  }
  0x39   :  { %4175 = vsyncadd [#allocation6], 4294967232  ;;  %vm124_vm0 = vcmask 261120   ;;  %s4895_s25 = sld [smem:[#allocation12_spill]]  ;;  %v3966_v14 = vld [vmem:[%s4876_s3] sm:$0xff]   ;;  %v4183_v15 = vmov 0.0  }
  0x3a   :  { %3559 = vmatprep.subr.bf16.mxu0 %v4183_v15  ;;  %v3967_v16 = vld [vmem:[%s4876_s3 + $0x8] sm:$0xff]   ;;  %vm4184_vm1 = vmmov 0   ;;  %s4896_s29 = sld [smem:[#allocation13_spill]]  ;;  %v3292_v29 = vld [vmem:[%s4875_s2] ss:$0 sm:$0xff]  ;;  %vm254_vm2 = vcmask 64512  }
  0x3b   :  { %3560 = vmatpush3.bf16.msra.mxu0 %v3966_v14  ;;  %3563 = vmatprep.mubr.msk.bf16.mxu0 %vm4184_vm1, %v4183_v15  ;;  %v3293_v34 = vld [vmem:[%s4877_s4] ss:$0 sm:$0xff]  ;;  %s4185_s7 = smov 112   ;;  %s4186_s27 = smov 120   ;;  %vm4393_vm3 = vmpackc.low %vm254_vm2, %vm254_vm2  ;;  %vm611_vm10 = vcmask 130048  }
  0x3c   :  { %3561 = vmatprep.subr.bf16.mxu0 %v4183_v15  ;;  %s4187_s1 = smov 104   ;;  %s4188_s8 = smov 96  }
  0x3f   :  { %v4338_v0 = vld [vmem:[%s4895_s25] sm:$0xff]  ;;  %v4343_v1 = vld [vmem:[%s4895_s25 + $0x8] sm:$0xff]  ;;  %3562 = vmatpush3.bf16.msra.mxu0 %v3967_v16  ;;  %s4189_s25 = smov 64  }
  0x40   :  { %v125_v2 = vsel %vm124_vm0, %v4338_v0, 0.0  ;;  %v128_v3 = vsel %vm124_vm0, %v4343_v1, 0.0  ;;  %v3291_v25 = vld [vmem:[%s4896_s29] ss:$0 sm:$0xff] }
  0x41   :  { %126 = vadd.xlane.f32.xlu0 %v125_v2 }
  0x45   :  { %129 = vadd.xlane.f32.xlu0 %v128_v3 }
  0xce   :  { %v127_v4 = vpop.xlane.xlu0 %126 }
  0xcf   :  { %v132_v5 = vmul.f32 0.03125, %v127_v4 }
  0xd1   :  { %v134_v6 = vsub.f32 %v4338_v0, %v132_v5 }
  0xd2   :  { %v130_v7 = vpop.xlane.xlu0 %129 }
  0xd3   :  { %v133_v8 = vmul.f32 0.03125, %v130_v7  ;;  %v136_v9 = vmul.f32 %v134_v6, %v134_v6 }
  0xd5   :  { %v135_v10 = vsub.f32 %v4343_v1, %v133_v8  ;;  %v138_v11 = vsel %vm124_vm0, %v136_v9, 0.0 }
  0xd6   :  { %139 = vadd.xlane.f32.xlu1 %v138_v11 }
  0xd7   :  { %v137_v12 = vmul.f32 %v135_v10, %v135_v10 }
  0xd9   :  { %v141_v13 = vsel %vm124_vm0, %v137_v12, 0.0 }
  0xda   :  { %142 = vadd.xlane.f32.xlu1 %v141_v13 }
 0x163   :  { %v140_v17 = vpop.xlane.xlu1 %139 }
 0x164   :  { %v144_v18 = vmul.f32 0.03125, %v140_v17 }
 0x166   :  { %v146_v19 = vadd.f32 1e-05, %v144_v18 }
 0x167   :  { %v143_v20 = vpop.xlane.xlu1 %142 }
 0x168   :  { %3992 = vrsqrt.f32 %v146_v19  ;;  %v145_v21 = vmul.f32 0.03125, %v143_v20 }
 0x16a   :  { %v147_v22 = vadd.f32 1e-05, %v145_v21 }
 0x16c   :  { %3994 = vrsqrt.f32 %v147_v22 }
 0x172   :  { %v3993_v23 = vpop.eup %3992 }
 0x173   :  { %v150_v24 = vmul.f32 %v3993_v23, %v134_v6  ;;  %v101_v6 = vlaneseq }
 0x175   :  { %v158_v28 = vmul.f32 %v3291_v25, %v150_v24  ;;  %v102_v7 = vshrl.u32 %v101_v6, 7  ;;  %v105_v9 = vand.u32 127, %v101_v6 }
 0x176   :  { %v3995_v26 = vpop.eup %3994 }
 0x177   :  { %v151_v27 = vmul.f32 %v3995_v26, %v135_v10  ;;  %v166_v31 = vadd.f32 %v3292_v29, %v158_v28  ;;  %v103_v8 = vadd.s32 8, %v102_v7  ;;  %vm110_vm5 = vcmp.ge.s32.totalorder %v105_v9, 8 }
 0x178   :  { %vm106_vm6 = vcmp.ge.s32.totalorder %v102_v7, %v105_v9  ;;  %vm115_vm7 = vcmp.lt.s32.totalorder %v105_v9, 8 }
 0x179   :  { %v159_v30 = vmul.f32 %v3291_v25, %v151_v27  ;;  %vm107_vm4 = vcmp.ge.s32.totalorder %v103_v8, %v105_v9  ;;  %vm4429_vm9 = vmand %vm106_vm6, %vm115_vm7 }
 0x17a   :  { %vm4425_vm8 = vmand %vm107_vm4, %vm110_vm5 }
 0x17b   :  { %v167_v32 = vadd.f32 %v3292_v29, %v159_v30 }
 0x17d   :  { %v168_v33 = vpack.c.bf16 %v167_v32, %v166_v31 }
 0x17f   :  { %3564 = vmatmul.mubr.msk.bf16.vlgmr.msra.gmra.mrb[0].mxu0 %vm124_vm0, %v168_v33 }
 0x252   :  { %v229_v35 = vpop.f32.mrb[0].mxu0 }
 0x253   :  { %v230_v36 = vadd.f32 %v3293_v34, %v229_v35  ;;  %v3565_v37 = vpop.f32.mrb[1].mxu0 }
 0x254   :  { %v232_v38 = vpop.f32.mrb[2].mxu0 }
 0x255   :  { %242 = vrot.lane.b32.xlu1 %v230_v36, %s4185_s7  ;;  %238 = vrot.lane.b32.xlu0 %v230_v36, %s4186_s27  ;;  %v3566_v39 = vpop.f32.mrb[3].mxu0  ;;  %v233_v40 = vadd.f32 %v3293_v34, %v232_v38 }
 0x256   :  { %3571 = vmatprep.mubr.msk.f32.mxu0 %vm254_vm2, %v230_v36 }
 0x257   :  { %v4378_v41 = vpack.i.bf16 %v233_v40, %v230_v36 }
 0x259   :  { %246 = vrot.lane.b32.xlu0 %v230_v36, %s4187_s1  ;;  %240 = vrot.lane.b32.xlu1 %v233_v40, %s4186_s27 }
 0x25d   :  { %3887 = vrot.lane.b32.xlu0 %v4378_v41, %s4188_s8  ;;  %244 = vrot.lane.b32.xlu1 %v233_v40, %s4185_s7 }
 0x261   :  { %248 = vrot.lane.b32.xlu1 %v233_v40, %s4187_s1 }
 0x2c7   :  { %v243_v42 = vpop.permute.xlu1 %242  ;;  %v239_v43 = vpop.permute.xlu0 %238 }
 0x2c8   :  { %3585 = vmatprep.mubr.msk.f32.mxu1 %vm254_vm2, %v243_v42 }
 0x2cb   :  { %v247_v44 = vpop.permute.xlu0 %246  ;;  %v241_v45 = vpop.permute.xlu1 %240 }
 0x2cc   :  { %v4385_v46 = vpack.i.bf16 %v241_v45, %v239_v43 }
 0x2ce   :  { %3892 = vrot.lane.b32.xlu1 %v4385_v46, %s4188_s8 }
 0x2cf   :  { %v3888_v47 = vpop.permute.xlu0 %3887  ;;  %v245_v48 = vpop.permute.xlu1 %244 }
 0x2d0   :  { %v3890_v49 = vunpack.i.h.bf16 %v3888_v47  ;;  %v3889_v50 = vunpack.i.l.bf16 %v3888_v47  ;;  %v4389_v51 = vpack.i.bf16 %v245_v48, %v243_v42 }
 0x2d2   :  { %v3791_v53 = vpack.c.bf16 %v3890_v49, %v3889_v50  ;;  %3897 = vrot.lane.b32.xlu0 %v4389_v51, %s4188_s8 }
 0x2d3   :  { %v249_v54 = vpop.permute.xlu1 %248 }
 0x2d4   :  { %v4399_v55 = vpack.i.bf16 %v249_v54, %v247_v44  ;;  %3793 = vmatprep.subr.msk.bf16.mxu0 %vm4393_vm3, %v3791_v53 }
 0x2d5   :  { %3796 = vmatpush3.bf16.xpose.msk.msra.mxu0 %vm4393_vm3, %v3791_v53 }
 0x2d6   :  { %3902 = vrot.lane.b32.xlu1 %v4399_v55, %s4188_s8 }
 0x2dc   :  { %3572 = vmatmul.mubr.msk.f32.vlgmr.msra.gmra.mrb[4].mxu0 %vm254_vm2, %v233_v40 }
 0x2dd   :  { %3578 = vmatprep.mubr.msk.f32.mxu0 %vm254_vm2, %v239_v43 }
 0x340   :  { %v3893_v56 = vpop.permute.xlu1 %3892 }
 0x341   :  { %v3895_v57 = vunpack.i.h.bf16 %v3893_v56  ;;  %v3894_v58 = vunpack.i.l.bf16 %v3893_v56 }
 0x343   :  { %v3797_v59 = vpack.c.bf16 %v3895_v57, %v3894_v58 }
 0x344   :  { %v3898_v60 = vpop.permute.xlu0 %3897 }
 0x345   :  { %v3900_v61 = vunpack.i.h.bf16 %v3898_v60  ;;  %v3899_v62 = vunpack.i.l.bf16 %v3898_v60  ;;  %3799 = vmatprep.subr.msk.bf16.mxu0 %vm4393_vm3, %v3797_v59 }
 0x346   :  { %3802 = vmatpush3.bf16.xpose.msk.msra.mxu0 %vm4393_vm3, %v3797_v59 }
 0x347   :  { %v3803_v63 = vpack.c.bf16 %v3900_v61, %v3899_v62 }
 0x348   :  { %v3903_v2 = vpop.permute.xlu1 %3902 }
 0x349   :  { %v3905_v3 = vunpack.i.h.bf16 %v3903_v2  ;;  %v3904_v4 = vunpack.i.l.bf16 %v3903_v2  ;;  %3805 = vmatprep.subr.msk.bf16.mxu1 %vm4393_vm3, %v3803_v63 }
 0x34a   :  { %3808 = vmatpush3.bf16.xpose.msk.msra.mxu1 %vm4393_vm3, %v3803_v63 }
 0x34b   :  { %v3809_v5 = vpack.c.bf16 %v3905_v3, %v3904_v4 }
 0x34d   :  { %3579 = vmatmul.mubr.msk.f32.vlgmr.msra.gmra.mrb[6].mxu0 %vm254_vm2, %v241_v45  ;;  %3811 = vmatprep.subr.msk.bf16.mxu0 %vm4393_vm3, %v3809_v5 }
 0x34e   :  { %3814 = vmatpush3.bf16.xpose.msk.msra.mxu0 %vm4393_vm3, %v3809_v5  ;;  %3592 = vmatprep.mubr.msk.f32.mxu0 %vm254_vm2, %v247_v44 }
 0x351   :  { %3586 = vmatmul.mubr.msk.f32.vlgmr.msra.gmra.mrb[0].mxu1 %vm254_vm2, %v245_v48 }
 0x355   :  { %3593 = vmatmul.mubr.msk.f32.vlgmr.msra.gmra.mrb[8].mxu0 %vm254_vm2, %v249_v54 }
 0x3af   :  { %v3573_v12 = vpop.f32.mrb[4].mxu0 }
 0x3b0   :  { %v604_v13 = vsel %vm4425_vm8, %v3573_v12, -100000.0  ;;  %v329_v14 = vpop.f32.mrb[5].mxu0 }
 0x3b1   :  { %v603_v16 = vsel %vm4429_vm9, %v329_v14, -100000.0  ;;  %v615_v17 = vsel %vm611_vm10, %v604_v13, -inf }
 0x3b2   :  { %616 = vmax.xlane.f32.xlu1 %v615_v17  ;;  %v612_v18 = vsel %vm611_vm10, %v603_v16, -inf }
 0x3b3   :  { %613 = vmax.xlane.f32.xlu0 %v612_v18 }
 0x420   :  { %v3580_v19 = vpop.f32.mrb[6].mxu0 }
 0x421   :  { %v606_v20 = vsel %vm4425_vm8, %v3580_v19, -100000.0  ;;  %v416_v21 = vpop.f32.mrb[7].mxu0 }
 0x422   :  { %v621_v22 = vsel %vm611_vm10, %v606_v20, -inf  ;;  %v605_v23 = vsel %vm4429_vm9, %v416_v21, -100000.0 }
 0x423   :  { %622 = vmax.xlane.f32.xlu0 %v621_v22  ;;  %v618_v28 = vsel %vm611_vm10, %v605_v23, -inf }
 0x424   :  { %v3587_v24 = vpop.f32.mrb[0].mxu1 }
 0x425   :  { %v608_v25 = vsel %vm4425_vm8, %v3587_v24, -100000.0  ;;  %v503_v26 = vpop.f32.mrb[1].mxu1 }
 0x426   :  { %v627_v27 = vsel %vm611_vm10, %v608_v25, -inf  ;;  %v607_v29 = vsel %vm4429_vm9, %v503_v26, -100000.0 }
 0x427   :  { %628 = vmax.xlane.f32.xlu1 %v627_v27  ;;  %619 = vmax.xlane.f32.xlu0 %v618_v28  ;;  %v624_v33 = vsel %vm611_vm10, %v607_v29, -inf }
 0x428   :  { %v3594_v30 = vpop.f32.mrb[8].mxu0 }
 0x429   :  { %v610_v31 = vsel %vm4425_vm8, %v3594_v30, -100000.0  ;;  %v590_v32 = vpop.f32.mrb[9].mxu0 }
 0x42a   :  { %v633_v34 = vsel %vm611_vm10, %v610_v31, -inf  ;;  %v609_v35 = vsel %vm4429_vm9, %v590_v32, -100000.0 }
 0x42b   :  { %625 = vmax.xlane.f32.xlu0 %v624_v33  ;;  %634 = vmax.xlane.f32.xlu1 %v633_v34  ;;  %v630_v36 = vsel %vm611_vm10, %v609_v35, -inf }
 0x42f   :  { %631 = vmax.xlane.f32.xlu0 %v630_v36 }
 0x43f   :  { %v617_v37 = vpop.xlane.xlu1 %616 }
 0x440   :  { %v637_v38 = vsub.f32 %v604_v13, %v617_v37  ;;  %v614_v39 = vpop.xlane.xlu0 %613 }
 0x441   :  { %v636_v40 = vsub.f32 %v603_v16, %v614_v39 }
 0x442   :  { %v646_v42 = vmul.f32 1.442695, %v637_v38 }
 0x443   :  { %v644_v43 = vmul.f32 1.442695, %v636_v40 }
 0x444   :  { %3996 = vpow2.f32 %v646_v42 }
 0x445   :  { %3998 = vpow2.f32 %v644_v43 }
 0x44e   :  { %v4457_v44 = vpop.eup %3996 }
 0x44f   :  { %v3999_v45 = vpop.eup %3998  ;;  %v663_v47 = vsel %vm611_vm10, %v4457_v44, 0.0 }
 0x450   :  { %664 = vadd.xlane.f32.xlu1 %v663_v47  ;;  %v660_v48 = vsel %vm611_vm10, %v3999_v45, 0.0 }
 0x451   :  { %661 = vadd.xlane.f32.xlu0 %v660_v48 }
 0x4b0   :  { %v623_v49 = vpop.xlane.xlu0 %622 }
 0x4b1   :  { %v639_v50 = vsub.f32 %v606_v20, %v623_v49 }
 0x4b3   :  { %v650_v53 = vmul.f32 1.442695, %v639_v50 }
 0x4b4   :  { %v629_v54 = vpop.xlane.xlu1 %628  ;;  %v620_v56 = vpop.xlane.xlu0 %619 }
 0x4b5   :  { %4000 = vpow2.f32 %v650_v53  ;;  %v641_v57 = vsub.f32 %v608_v25, %v629_v54  ;;  %v638_v58 = vsub.f32 %v605_v23, %v620_v56 }
 0x4b7   :  { %v654_v59 = vmul.f32 1.442695, %v641_v57  ;;  %v648_v60 = vmul.f32 1.442695, %v638_v58 }
 0x4b8   :  { %v626_v61 = vpop.xlane.xlu0 %625  ;;  %v635_v62 = vpop.xlane.xlu1 %634 }
 0x4b9   :  { %4002 = vpow2.f32 %v654_v59  ;;  %v640_v63 = vsub.f32 %v607_v29, %v626_v61  ;;  %v643_v2 = vsub.f32 %v610_v31, %v635_v62 }
 0x4ba   :  { %4004 = vpow2.f32 %v648_v60 }
 0x4bb   :  { %v652_v3 = vmul.f32 1.442695, %v640_v63  ;;  %v658_v4 = vmul.f32 1.442695, %v643_v2  ;;  %v1048_v2 = vld [vmem:[%s4878_s5] sm:$0xff] }
 0x4bc   :  { %v632_v5 = vpop.xlane.xlu0 %631 }
 0x4bd   :  { %4006 = vpow2.f32 %v652_v3  ;;  %v642_v6 = vsub.f32 %v609_v35, %v632_v5  ;;  %v1049_v3 = vld [vmem:[%s4878_s5 + $0x8] sm:$0xff]  ;;  %v1051_v5 = vld [vmem:[%s4878_s5 + $0x18] sm:$0xff] }
 0x4be   :  { %4008 = vpow2.f32 %v658_v4  ;;  %v1050_v4 = vld [vmem:[%s4878_s5 + $0x10] sm:$0xff] }
 0x4bf   :  { %v4462_v7 = vpop.eup %4000  ;;  %v656_v8 = vmul.f32 1.442695, %v642_v6 }
 0x4c0   :  { %v669_v9 = vsel %vm611_vm10, %v4462_v7, 0.0 }
 0x4c1   :  { %4010 = vpow2.f32 %v656_v8  ;;  %670 = vadd.xlane.f32.xlu1 %v669_v9 }
 0x4c3   :  { %v4466_v12 = vpop.eup %4002 }
 0x4c4   :  { %v4468_v13 = vpop.eup %4004  ;;  %v675_v14 = vsel %vm611_vm10, %v4466_v12, 0.0 }
 0x4c5   :  { %676 = vadd.xlane.f32.xlu1 %v675_v14  ;;  %v666_v16 = vsel %vm611_vm10, %v4468_v13, 0.0 }
 0x4c6   :  { %667 = vadd.xlane.f32.xlu0 %v666_v16 }
 0x4c7   :  { %v4007_v17 = vpop.eup %4006 }
 0x4c8   :  { %v4474_v18 = vpop.eup %4008  ;;  %v672_v19 = vsel %vm611_vm10, %v4007_v17, 0.0 }
 0x4c9   :  { %v681_v20 = vsel %vm611_vm10, %v4474_v18, 0.0 }
 0x4ca   :  { %682 = vadd.xlane.f32.xlu1 %v681_v20  ;;  %673 = vadd.xlane.f32.xlu0 %v672_v19 }
 0x4cb   :  { %v4479_v21 = vpop.eup %4010 }
 0x4cc   :  { %v678_v22 = vsel %vm611_vm10, %v4479_v21, 0.0 }
 0x4ce   :  { %679 = vadd.xlane.f32.xlu0 %v678_v22 }
 0x4db   :  { %3912 = vrot.lane.b32.xlu1 %v4385_v46, %s4189_s25 }
 0x4dd   :  { %v665_v26 = vpop.xlane.xlu1 %664 }
 0x4de   :  { %v662_v23 = vpop.xlane.xlu0 %661 }
 0x4df   :  { %3917 = vrot.lane.b32.xlu1 %v4389_v51, %s4189_s25  ;;  %4012 = vrcp.f32 %v662_v23 }
 0x4e0   :  { %4014 = vrcp.f32 %v665_v26 }
 0x4e3   :  { %3922 = vrot.lane.b32.xlu1 %v4399_v55, %s4189_s25 }
 0x4e4   :  { %3907 = vrot.lane.b32.xlu0 %v4378_v41, %s4189_s25 }
 0x4e9   :  { %v4013_v24 = vpop.eup %4012 }
 0x4ea   :  { %v692_v25 = vmul.f32 %v4013_v24, %v3999_v45  ;;  %v4015_v38 = vpop.eup %4014 }
 0x4eb   :  { %v693_v54 = vmul.f32 %v4015_v38, %v4457_v44 }
 0x4ec   :  { %3599 = vmatprep.mubr.msk.f32.mxu1 %vm611_vm10, %v692_v25 }
 0x54e   :  { %v671_v27 = vpop.xlane.xlu1 %670 }
 0x552   :  { %v677_v28 = vpop.xlane.xlu1 %676 }
 0x553   :  { %v668_v29 = vpop.xlane.xlu0 %667  ;;  %4016 = vrcp.f32 %v677_v28 }
 0x557   :  { %v683_v46 = vpop.xlane.xlu1 %682  ;;  %v674_v30 = vpop.xlane.xlu0 %673 }
 0x558   :  { %4018 = vrcp.f32 %v674_v30 }
 0x559   :  { %4020 = vrcp.f32 %v668_v29 }
 0x55a   :  { %4022 = vrcp.f32 %v671_v27 }
 0x55b   :  { %v3913_v51 = vpop.permute.xlu1 %3912  ;;  %v680_v31 = vpop.xlane.xlu0 %679 }
 0x55c   :  { %4024 = vrcp.f32 %v680_v31  ;;  %v3915_v55 = vunpack.i.h.bf16 %v3913_v51  ;;  %v3914_v41 = vunpack.i.l.bf16 %v3913_v51 }
 0x55d   :  { %4026 = vrcp.f32 %v683_v46  ;;  %v4017_v39 = vpop.eup %4016 }
 0x55e   :  { %v3819_v48 = vpack.c.bf16 %v3915_v55, %v3914_v41  ;;  %v697_v56 = vmul.f32 %v4017_v39, %v4466_v12  ;;  %v3329_v41 = vld [vmem:[%s4879_s6] ss:$0 sm:$0xff] }
 0x55f   :  { %v3918_v32 = vpop.permute.xlu1 %3917  ;;  %v3908_v33 = vpop.permute.xlu0 %3907 }
 0x560   :  { %v3920_v34 = vunpack.i.h.bf16 %v3918_v32  ;;  %v3919_v35 = vunpack.i.l.bf16 %v3918_v32  ;;  %v3910_v36 = vunpack.i.h.bf16 %v3908_v33  ;;  %v3909_v37 = vunpack.i.l.bf16 %v3908_v33 }
 0x562   :  { %v3823_v40 = vpack.c.bf16 %v3920_v34, %v3919_v35  ;;  %v3815_v42 = vpack.c.bf16 %v3910_v36, %v3909_v37  ;;  %v4019_v43 = vpop.eup %4018 }
 0x563   :  { %v3923_v45 = vpop.permute.xlu1 %3922  ;;  %v4021_v47 = vpop.eup %4020  ;;  %v696_v53 = vmul.f32 %v4019_v43, %v4007_v17 }
 0x564   :  { %v3925_v49 = vunpack.i.h.bf16 %v3923_v45  ;;  %v3924_v50 = vunpack.i.l.bf16 %v3923_v45  ;;  %3816 = vmatprep.subr.bf16.mxu1 %v3815_v42  ;;  %3824 = vmatprep.subr.bf16.mxu0 %v3823_v40  ;;  %v4023_v57 = vpop.eup %4022  ;;  %v694_v58 = vmul.f32 %v4021_v47, %v4468_v13 }
 0x565   :  { %3818 = vmatpush3.bf16.msra.mxu1 %v3815_v42  ;;  %3826 = vmatpush3.bf16.msra.mxu0 %v3823_v40  ;;  %v695_v61 = vmul.f32 %v4023_v57, %v4462_v7  ;;  %v3969_v57 = vld [vmem:[%s4882_s9 + $0x8] sm:$0xff]  }
 0x566   :  { %3613 = vmatprep.mubr.msk.f32.mxu0 %vm611_vm10, %v696_v53  ;;  %3820 = vmatprep.subr.bf16.mxu1 %v3819_v48  ;;  %v4025_v59 = vpop.eup %4024  ;;  %v3827_v60 = vpack.c.bf16 %v3925_v49, %v3924_v50 }
 0x567   :  { %v4027_v44 = vpop.eup %4026  ;;  %v698_v62 = vmul.f32 %v4025_v59, %v4479_v21  ;;  %3623 = vmatprep.subr.mxu0 %v1048_v2  ;;  %v3971_v59 = vld [vmem:[%s4884_s11 + $0x8] sm:$0xff]  }
 0x568   :  { %3600 = vmatmul.mubr.msk.f32.vlgmr.msra.gmra.mrb[2].mxu1 %vm611_vm10, %v693_v54  ;;  %3614 = vmatmul.mubr.msk.f32.vlgmr.msra.gmra.mrb[10].mxu0 %vm611_vm10, %v697_v56  ;;  %v699_v63 = vmul.f32 %v4027_v44, %v4474_v18  ;;  %v3968_v56 = vld [vmem:[%s4882_s9] sm:$0xff]  }
 0x569   :  { %3822 = vmatpush3.bf16.msra.mxu1 %v3819_v48  ;;  %3606 = vmatprep.mubr.msk.f32.mxu1 %vm611_vm10, %v694_v58  ;;  %v3970_v58 = vld [vmem:[%s4884_s11] sm:$0xff]  }
 0x56a   :  { %3828 = vmatprep.subr.bf16.mxu1 %v3827_v60  ;;  %3624 = vmatpush3.msra.mxu0 %v1048_v2 }
 0x56b   :  { %3633 = vmatprep.subr.mxu0 %v1050_v4 }
 0x56c   :  { %3607 = vmatmul.mubr.msk.f32.vlgmr.msra.gmra.mrb[4].mxu1 %vm611_vm10, %v695_v61 }
 0x56d   :  { %3830 = vmatpush3.bf16.msra.mxu1 %v3827_v60  ;;  %3620 = vmatprep.mubr.msk.f32.mxu1 %vm611_vm10, %v698_v62 }
 0x56e   :  { %3628 = vmatprep.subr.mxu1 %v1049_v3 }
 0x570   :  { %3621 = vmatmul.mubr.msk.f32.vlgmr.msra.gmra.mrb[6].mxu1 %vm611_vm10, %v699_v63 }
 0x571   :  { %3629 = vmatpush3.msra.mxu1 %v1049_v3 }
 0x572   :  { %3638 = vmatprep.subr.mxu1 %v1051_v5 }
 0x63b   :  { %v3601_v6 = vpop.f32.mrb[2].mxu1  ;;  %v3615_v7 = vpop.f32.mrb[10].mxu0 }
 0x63c   :  { %v778_v8 = vpop.f32.mrb[3].mxu1  ;;  %v952_v9 = vpop.f32.mrb[11].mxu0 }
 0x63d   :  { %3625 = vmatprep.mubr.msk.f32.mxu0 %vm254_vm2, %v778_v8 }
 0x63e   :  { %3626 = vmatmul.mubr.msk.f32.vlgmr.msra.gmra.mrb[12].mxu0 %vm254_vm2, %v3601_v6 }
 0x63f   :  { %v3608_v12 = vpop.f32.mrb[4].mxu1  ;;  %3635 = vmatprep.mubr.msk.f32.mxu0 %vm254_vm2, %v952_v9  ;;  %3634 = vmatpush3.msra.mxu0 %v1050_v4  ;;  %v3331_v9 = vld [vmem:[#allocation5] ss:$0 sm:$0xff] }
 0x640   :  { %v865_v13 = vpop.f32.mrb[5].mxu1  ;;  %3643 = vmatprep.subr.bf16.mxu0 %v4183_v15 }
 0x641   :  { %3630 = vmatprep.mubr.msk.f32.mxu1 %vm254_vm2, %v865_v13 }
 0x642   :  { %3631 = vmatmul.mubr.msk.f32.vlgmr.msra.gmra.mrb[8].mxu1 %vm254_vm2, %v3608_v12  ;;  %3636 = vmatmul.mubr.msk.f32.vlgmr.msra.gmra.mrb[14].mxu0 %vm254_vm2, %v3615_v7 }
 0x643   :  { %v3622_v14 = vpop.f32.mrb[6].mxu1  ;;  %3639 = vmatpush3.msra.mxu1 %v1051_v5  ;;  %3647 = vmatprep.mubr.msk.bf16.mxu0 %vm4184_vm1, %v4183_v15  ;;  %v3330_v5 = vld [vmem:[#allocation2] ss:$0 sm:$0xff] }
 0x644   :  { %v1039_v16 = vpop.f32.mrb[7].mxu1  ;;  %3651 = vmatprep.subr.bf16.mxu1 %v4183_v15  ;;  %3644 = vmatpush3.bf16.msra.mxu0 %v3968_v56 }
 0x645   :  { %3640 = vmatprep.mubr.msk.f32.mxu1 %vm254_vm2, %v1039_v16  ;;  %3645 = vmatprep.subr.bf16.mxu0 %v4183_v15 }
 0x646   :  { %3641 = vmatmul.mubr.msk.f32.vlgmr.msra.gmra.mrb[10].mxu1 %vm254_vm2, %v3622_v14 }
 0x647   :  { %3667 = vmatprep.mubr.msk.bf16.mxu1 %vm4184_vm1, %v4183_v15  ;;  %3652 = vmatpush3.bf16.msra.mxu1 %v3970_v58 }
 0x648   :  { %3646 = vmatpush3.bf16.msra.mxu0 %v3969_v57  ;;  %3653 = vmatprep.subr.bf16.mxu1 %v4183_v15 }
 0x649   :  { %3671 = vmatprep.subr.bf16.mxu0 %v4183_v15 }
 0x64b   :  { %3654 = vmatpush3.bf16.msra.mxu1 %v3971_v59 }
 0x64c   :  { %3655 = vmatprep.subr.bf16.mxu1 %v4183_v15 }
 0x711   :  { %v3627_v17 = vpop.f32.mrb[12].mxu0 }
 0x712   :  { %v1124_v18 = vpop.f32.mrb[13].mxu0  ;;  %v1383_v21 = vsel %vm124_vm0, %v3627_v17, 0.0  ;;  %v3972_v17 = vld [vmem:[%s4884_s11 + $0x10] sm:$0xff]  }
 0x713   :  { %v1376_v25 = vsel %vm124_vm0, %v1124_v18, 0.0  ;;  %3656 = vmatpush3.bf16.msra.mxu1 %v3972_v17  ;;  %v3973_v18 = vld [vmem:[%s4884_s11 + $0x18] sm:$0xff]  }
 0x714   :  { %3657 = vmatprep.subr.bf16.mxu1 %v4183_v15 }
 0x715   :  { %v3632_v19 = vpop.f32.mrb[8].mxu1  ;;  %v3637_v20 = vpop.f32.mrb[14].mxu0 }
 0x716   :  { %v1384_v22 = vsel %vm124_vm0, %v3632_v19, 0.0  ;;  %v1205_v23 = vpop.f32.mrb[9].mxu1  ;;  %v1286_v24 = vpop.f32.mrb[15].mxu0  ;;  %v1386_v28 = vsel %vm124_vm0, %v3637_v20, 0.0  ;;  %v3974_v19 = vld [vmem:[%s4884_s11 + $0x20] sm:$0xff]   ;;  %v3975_v20 = vld [vmem:[%s4884_s11 + $0x28] sm:$0xff]  }
 0x717   :  { %v1385_v26 = vadd.f32 %v1384_v22, %v1383_v21  ;;  %v1377_v27 = vsel %vm124_vm0, %v1205_v23, 0.0  ;;  %v1379_v30 = vsel %vm124_vm0, %v1286_v24, 0.0  ;;  %3658 = vmatpush3.bf16.msra.mxu1 %v3973_v18  ;;  %v3976_v21 = vld [vmem:[%s4884_s11 + $0x30] sm:$0xff]   ;;  %v3977_v22 = vld [vmem:[%s4884_s11 + $0x38] sm:$0xff]   ;;  %v3332_v23 = vld [vmem:[#allocation7] ss:$0 sm:$0xff] }
 0x718   :  { %v1378_v29 = vadd.f32 %v1377_v27, %v1376_v25  ;;  %3659 = vmatprep.subr.bf16.mxu1 %v4183_v15 }
 0x719   :  { %v1387_v46 = vadd.f32 %v1386_v28, %v1385_v26  ;;  %v3642_v51 = vpop.f32.mrb[10].mxu1 }
 0x71a   :  { %v1380_v31 = vadd.f32 %v1379_v30, %v1378_v29  ;;  %v1388_v55 = vsel %vm124_vm0, %v3642_v51, 0.0  ;;  %v1367_v32 = vpop.f32.mrb[11].mxu1 }
 0x71b   :  { %v1389_v33 = vadd.f32 %v1388_v55, %v1387_v46  ;;  %v1381_v34 = vsel %vm124_vm0, %v1367_v32, 0.0  ;;  %3660 = vmatpush3.bf16.msra.mxu1 %v3974_v19 }
 0x71c   :  { %v1382_v35 = vadd.f32 %v1381_v34, %v1380_v31  ;;  %3661 = vmatprep.subr.bf16.mxu1 %v4183_v15 }
 0x71d   :  { %v1398_v36 = vadd.f32 %v3329_v41, %v1389_v33 }
 0x71e   :  { %v1397_v37 = vadd.f32 %v3329_v41, %v1382_v35 }
 0x71f   :  { %v4543_v38 = vadd.f32 %v1398_v36, %v4343_v1  ;;  %3662 = vmatpush3.bf16.msra.mxu1 %v3975_v20 }
 0x720   :  { %v4546_v39 = vadd.f32 %v1397_v37, %v4338_v0  ;;  %3663 = vmatprep.subr.bf16.mxu1 %v4183_v15  ;;  %v3336_v37 = vld [vmem:[%s4885_s12] ss:$0 sm:$0xff] }
 0x721   :  { %v1406_v40 = vsel %vm124_vm0, %v4543_v38, 0.0 }
 0x722   :  { %1407 = vadd.xlane.f32.xlu1 %v1406_v40  ;;  %v1403_v42 = vsel %vm124_vm0, %v4546_v39, 0.0 }
 0x723   :  { %1404 = vadd.xlane.f32.xlu0 %v1403_v42  ;;  %3664 = vmatpush3.bf16.msra.mxu1 %v3976_v21  ;;  %v3354_v21 = vld [vmem:[%s4877_s4 + $0x1] ss:$0 sm:$0xff] }
 0x724   :  { %3665 = vmatprep.subr.bf16.mxu1 %v4183_v15 }
 0x727   :  { %3666 = vmatpush3.bf16.msra.mxu1 %v3977_v22 }
 0x7af   :  { %v1408_v43 = vpop.xlane.xlu1 %1407 }
 0x7b0   :  { %v1410_v45 = vmul.f32 0.03125, %v1408_v43  ;;  %v1405_v47 = vpop.xlane.xlu0 %1404 }
 0x7b1   :  { %v1409_v48 = vmul.f32 0.03125, %v1405_v47 }
 0x7b2   :  { %v1412_v49 = vsub.f32 %v4543_v38, %v1410_v45 }
 0x7b3   :  { %v1411_v1 = vsub.f32 %v4546_v39, %v1409_v48 }
 0x7b4   :  { %v1414_v53 = vmul.f32 %v1412_v49, %v1412_v49 }
 0x7b5   :  { %v1413_v50 = vmul.f32 %v1411_v1, %v1411_v1 }
 0x7b6   :  { %v1418_v54 = vsel %vm124_vm0, %v1414_v53, 0.0 }
 0x7b7   :  { %v1415_v0 = vsel %vm124_vm0, %v1413_v50, 0.0 }
 0x7b8   :  { %1416 = vadd.xlane.f32.xlu0 %v1415_v0 }
 0x7bc   :  { %1419 = vadd.xlane.f32.xlu0 %v1418_v54 }
 0x845   :  { %v1417_v60 = vpop.xlane.xlu0 %1416 }
 0x846   :  { %v1421_v61 = vmul.f32 0.03125, %v1417_v60 }
 0x848   :  { %v1423_v44 = vadd.f32 1e-05, %v1421_v61 }
 0x849   :  { %v1420_v62 = vpop.xlane.xlu0 %1419 }
 0x84a   :  { %4028 = vrsqrt.f32 %v1423_v44  ;;  %v1422_v63 = vmul.f32 0.03125, %v1420_v62  ;;  %v3978_v44 = vld [vmem:[%s4876_s3 + $0x10] sm:$0xff]   ;;  %v3979_v62 = vld [vmem:[%s4876_s3 + $0x18] sm:$0xff]  }
 0x84c   :  { %v1424_v2 = vadd.f32 1e-05, %v1422_v63 }
 0x84e   :  { %4030 = vrsqrt.f32 %v1424_v2 }
 0x854   :  { %v4029_v3 = vpop.eup %4028 }
 0x855   :  { %v1427_v4 = vmul.f32 %v4029_v3, %v1411_v1 }
 0x857   :  { %v1435_v7 = vmul.f32 %v3330_v5, %v1427_v4 }
 0x858   :  { %v4031_v6 = vpop.eup %4030 }
 0x859   :  { %v1428_v8 = vmul.f32 %v4031_v6, %v1412_v49  ;;  %v1443_v13 = vadd.f32 %v3331_v9, %v1435_v7 }
 0x85b   :  { %v1436_v12 = vmul.f32 %v3330_v5, %v1428_v8  ;;  %v3347_v8 = vld [vmem:[%s4896_s29 + $0x1] ss:$0 sm:$0xff] }
 0x85d   :  { %v1444_v14 = vadd.f32 %v3331_v9, %v1436_v12 }
 0x85f   :  { %v1445_v16 = vpack.c.bf16 %v1444_v14, %v1443_v13 }
 0x861   :  { %3648 = vmatmul.mubr.msk.bf16.vlgmr.msra.gmra.mrb[16].mxu0 %vm124_vm0, %v1445_v16  ;;  %v3348_v16 = vld [vmem:[%s4875_s2 + $0x1] ss:$0 sm:$0xff] }
 0x862   :  { %3675 = vmatprep.mubr.msk.bf16.mxu0 %vm4184_vm1, %v4183_v15  ;;  %3672 = vmatpush3.bf16.msra.mxu0 %v3978_v44 }
 0x863   :  { %3673 = vmatprep.subr.bf16.mxu0 %v4183_v15 }
 0x866   :  { %3674 = vmatpush3.bf16.msra.mxu0 %v3979_v62 }
 0x934   :  { %v1506_v24 = vpop.f32.mrb[16].mxu0 }
 0x935   :  { %v1507_v25 = vadd.f32 %v3332_v23, %v1506_v24  ;;  %v3649_v26 = vpop.f32.mrb[17].mxu0 }
 0x936   :  { %v1509_v27 = vpop.f32.mrb[18].mxu0 }
 0x937   :  { %v1516_v28 = vmul.f32 0.70710677, %v1507_v25  ;;  %v1510_v29 = vadd.f32 %v3332_v23, %v1509_v27  ;;  %v3650_v46 = vpop.f32.mrb[19].mxu0  ;;  %v1513_v41 = vmul.f32 0.5, %v1507_v25 }
 0x939   :  { %4032 = verf.f32 %v1516_v28  ;;  %v1517_v30 = vmul.f32 0.70710677, %v1510_v29  ;;  %v1514_v32 = vmul.f32 0.5, %v1510_v29 }
 0x93b   :  { %4034 = verf.f32 %v1517_v30 }
 0x943   :  { %v4033_v51 = vpop.eup %4032 }
 0x944   :  { %v1520_v31 = vadd.f32 1.0, %v4033_v51 }
 0x945   :  { %v4035_v55 = vpop.eup %4034 }
 0x946   :  { %v1521_v33 = vadd.f32 1.0, %v4035_v55  ;;  %v1522_v34 = vmul.f32 %v1520_v31, %v1513_v41 }
 0x948   :  { %v1523_v35 = vmul.f32 %v1521_v33, %v1514_v32 }
 0x94a   :  { %v1524_v36 = vpack.c.bf16 %v1523_v35, %v1522_v34 }
 0x94c   :  { %3668 = vmatmul.mubr.bf16.vlgmr.msra.gmra.mrb[12].mxu1 %v1524_v36 }
 0xa1f   :  { %v1630_v40 = vpop.f32.mrb[12].mxu1 }
 0xa20   :  { %v1631_v42 = vadd.f32 %v3336_v37, %v1630_v40  ;;  %v3669_v43 = vpop.f32.mrb[13].mxu1 }
 0xa21   :  { %v1633_v45 = vpop.f32.mrb[14].mxu1 }
 0xa22   :  { %v4602_v47 = vadd.f32 %v1631_v42, %v4546_v39  ;;  %v1634_v48 = vadd.f32 %v3336_v37, %v1633_v45  ;;  %v3670_v49 = vpop.f32.mrb[15].mxu1 }
 0xa24   :  { %v4605_v1 = vadd.f32 %v1634_v48, %v4543_v38  ;;  %v1643_v50 = vsel %vm124_vm0, %v4602_v47, 0.0 }
 0xa25   :  { %1644 = vadd.xlane.f32.xlu0 %v1643_v50 }
 0xa26   :  { %v1646_v0 = vsel %vm124_vm0, %v4605_v1, 0.0 }
 0xa27   :  { %1647 = vadd.xlane.f32.xlu1 %v1646_v0 }
 0xab2   :  { %v1645_v53 = vpop.xlane.xlu0 %1644 }
 0xab3   :  { %v1649_v54 = vmul.f32 0.03125, %v1645_v53 }
 0xab4   :  { %v1648_v56 = vpop.xlane.xlu1 %1647 }
 0xab5   :  { %v1651_v57 = vsub.f32 %v4602_v47, %v1649_v54  ;;  %v1650_v39 = vmul.f32 0.03125, %v1648_v56 }
 0xab7   :  { %v1652_v58 = vsub.f32 %v4605_v1, %v1650_v39  ;;  %v1653_v59 = vmul.f32 %v1651_v57, %v1651_v57 }
 0xab9   :  { %v1655_v38 = vsel %vm124_vm0, %v1653_v59, 0.0  ;;  %v1654_v60 = vmul.f32 %v1652_v58, %v1652_v58 }
 0xaba   :  { %1656 = vadd.xlane.f32.xlu0 %v1655_v38 }
 0xabb   :  { %v1658_v61 = vsel %vm124_vm0, %v1654_v60, 0.0 }
 0xabc   :  { %1659 = vadd.xlane.f32.xlu1 %v1658_v61 }
 0xb47   :  { %v1657_v63 = vpop.xlane.xlu0 %1656 }
 0xb48   :  { %v1661_v2 = vmul.f32 0.03125, %v1657_v63 }
 0xb49   :  { %v1660_v3 = vpop.xlane.xlu1 %1659 }
 0xb4a   :  { %v1663_v4 = vadd.f32 1e-05, %v1661_v2  ;;  %v1662_v5 = vmul.f32 0.03125, %v1660_v3 }
 0xb4c   :  { %4036 = vrsqrt.f32 %v1663_v4  ;;  %v1664_v6 = vadd.f32 1e-05, %v1662_v5 }
 0xb4e   :  { %4038 = vrsqrt.f32 %v1664_v6 }
 0xb56   :  { %v4037_v7 = vpop.eup %4036 }
 0xb57   :  { %v1667_v9 = vmul.f32 %v4037_v7, %v1651_v57 }
 0xb58   :  { %v4039_v12 = vpop.eup %4038 }
 0xb59   :  { %v1675_v13 = vmul.f32 %v3347_v8, %v1667_v9  ;;  %v1668_v14 = vmul.f32 %v4039_v12, %v1652_v58 }
 0xb5b   :  { %v1676_v17 = vmul.f32 %v3347_v8, %v1668_v14  ;;  %v1683_v18 = vadd.f32 %v3348_v16, %v1675_v13 }
 0xb5d   :  { %v1684_v19 = vadd.f32 %v3348_v16, %v1676_v17 }
 0xb5f   :  { %v1685_v20 = vpack.c.bf16 %v1684_v19, %v1683_v18 }
 0xb61   :  { %3676 = vmatmul.mubr.msk.bf16.vlgmr.msra.gmra.mrb[20].mxu0 %vm124_vm0, %v1685_v20 }
 0xc34   :  { %v1748_v22 = vpop.f32.mrb[20].mxu0 }
 0xc35   :  { %v1749_v23 = vadd.f32 %v3354_v21, %v1748_v22  ;;  %v3677_v24 = vpop.f32.mrb[21].mxu0 }
 0xc36   :  { %v1751_v25 = vpop.f32.mrb[22].mxu0 }
 0xc37   :  { %v1752_v26 = vadd.f32 %v3354_v21, %v1751_v25  ;;  %1757 = vrot.lane.b32.xlu0 %v1749_v23, %s4186_s27  ;;  %v3678_v27 = vpop.f32.mrb[23].mxu0  ;;  %3683 = vmatprep.mubr.msk.f32.mxu0 %vm254_vm2, %v1749_v23 }
 0xc39   :  { %1759 = vrot.lane.b32.xlu1 %v1752_v26, %s4186_s27  ;;  %v4637_v28 = vpack.i.bf16 %v1752_v26, %v1749_v23 }
 0xc3b   :  { %1765 = vrot.lane.b32.xlu0 %v1749_v23, %s4187_s1 }
 0xc3d   :  { %1761 = vrot.lane.b32.xlu1 %v1749_v23, %s4185_s7 }
 0xc3f   :  { %3927 = vrot.lane.b32.xlu0 %v4637_v28, %s4188_s8 }
 0xc41   :  { %1763 = vrot.lane.b32.xlu1 %v1752_v26, %s4185_s7 }
 0xc45   :  { %1767 = vrot.lane.b32.xlu1 %v1752_v26, %s4187_s1 }
 0xca9   :  { %v1758_v29 = vpop.permute.xlu0 %1757 }
 0xcab   :  { %v1760_v46 = vpop.permute.xlu1 %1759 }
 0xcac   :  { %v4643_v30 = vpack.i.bf16 %v1760_v46, %v1758_v29 }
 0xcad   :  { %v1766_v51 = vpop.permute.xlu0 %1765 }
 0xcae   :  { %3704 = vmatprep.mubr.msk.f32.mxu1 %vm254_vm2, %v1766_v51  ;;  %3932 = vrot.lane.b32.xlu1 %v4643_v30, %s4188_s8 }
 0xcaf   :  { %v1762_v31 = vpop.permute.xlu1 %1761 }
 0xcb1   :  { %v3928_v55 = vpop.permute.xlu0 %3927 }
 0xcb2   :  { %v3930_v41 = vunpack.i.h.bf16 %v3928_v55  ;;  %v3929_v32 = vunpack.i.l.bf16 %v3928_v55 }
 0xcb3   :  { %v1764_v33 = vpop.permute.xlu1 %1763 }
 0xcb4   :  { %v3831_v34 = vpack.c.bf16 %v3930_v41, %v3929_v32  ;;  %v4648_v35 = vpack.i.bf16 %v1764_v33, %v1762_v31 }
 0xcb6   :  { %3833 = vmatprep.subr.msk.bf16.mxu0 %vm4393_vm3, %v3831_v34  ;;  %3937 = vrot.lane.b32.xlu0 %v4648_v35, %s4188_s8 }
 0xcb7   :  { %3836 = vmatpush3.bf16.xpose.msk.msra.mxu0 %vm4393_vm3, %v3831_v34  ;;  %v1768_v36 = vpop.permute.xlu1 %1767 }
 0xcb8   :  { %v4656_v37 = vpack.i.bf16 %v1768_v36, %v1766_v51 }
 0xcba   :  { %3942 = vrot.lane.b32.xlu1 %v4656_v37, %s4188_s8 }
 0xcbe   :  { %3684 = vmatmul.mubr.msk.f32.vlgmr.msra.gmra.mrb[24].mxu0 %vm254_vm2, %v1752_v26 }
 0xcbf   :  { %3690 = vmatprep.mubr.msk.f32.mxu0 %vm254_vm2, %v1758_v29 }
 0xd20   :  { %v3933_v40 = vpop.permute.xlu1 %3932 }
 0xd21   :  { %v3935_v42 = vunpack.i.h.bf16 %v3933_v40  ;;  %v3934_v43 = vunpack.i.l.bf16 %v3933_v40 }
 0xd23   :  { %v3837_v45 = vpack.c.bf16 %v3935_v42, %v3934_v43 }
 0xd25   :  { %3839 = vmatprep.subr.msk.bf16.mxu0 %vm4393_vm3, %v3837_v45 }
 0xd26   :  { %3842 = vmatpush3.bf16.xpose.msk.msra.mxu0 %vm4393_vm3, %v3837_v45 }
 0xd28   :  { %v3938_v48 = vpop.permute.xlu0 %3937 }
 0xd29   :  { %v3940_v49 = vunpack.i.h.bf16 %v3938_v48  ;;  %v3939_v50 = vunpack.i.l.bf16 %v3938_v48 }
 0xd2b   :  { %v3843_v0 = vpack.c.bf16 %v3940_v49, %v3939_v50 }
 0xd2c   :  { %v3943_v53 = vpop.permute.xlu1 %3942 }
 0xd2d   :  { %v3945_v54 = vunpack.i.h.bf16 %v3943_v53  ;;  %v3944_v56 = vunpack.i.l.bf16 %v3943_v53  ;;  %3691 = vmatmul.mubr.msk.f32.vlgmr.msra.gmra.mrb[26].mxu0 %vm254_vm2, %v1760_v46  ;;  %3845 = vmatprep.subr.msk.bf16.mxu0 %vm4393_vm3, %v3843_v0 }
 0xd2e   :  { %3848 = vmatpush3.bf16.xpose.msk.msra.mxu0 %vm4393_vm3, %v3843_v0  ;;  %3697 = vmatprep.mubr.msk.f32.mxu0 %vm254_vm2, %v1762_v31 }
 0xd2f   :  { %v3849_v57 = vpack.c.bf16 %v3945_v54, %v3944_v56 }
 0xd31   :  { %3851 = vmatprep.subr.msk.bf16.mxu1 %vm4393_vm3, %v3849_v57 }
 0xd32   :  { %3854 = vmatpush3.bf16.xpose.msk.msra.mxu1 %vm4393_vm3, %v3849_v57 }
 0xd35   :  { %3698 = vmatmul.mubr.msk.f32.vlgmr.msra.gmra.mrb[28].mxu0 %vm254_vm2, %v1764_v33 }
 0xd39   :  { %3705 = vmatmul.mubr.msk.f32.vlgmr.msra.gmra.mrb[16].mxu1 %vm254_vm2, %v1768_v36 }
 0xd91   :  { %v3685_v39 = vpop.f32.mrb[24].mxu0 }
 0xd92   :  { %v2118_v58 = vsel %vm4425_vm8, %v3685_v39, -100000.0  ;;  %v1847_v59 = vpop.f32.mrb[25].mxu0 }
 0xd93   :  { %v2117_v38 = vsel %vm4429_vm9, %v1847_v59, -100000.0  ;;  %v2128_v60 = vsel %vm611_vm10, %v2118_v58, -inf }
 0xd94   :  { %2129 = vmax.xlane.f32.xlu1 %v2128_v60  ;;  %v2125_v61 = vsel %vm611_vm10, %v2117_v38, -inf }
 0xd95   :  { %2126 = vmax.xlane.f32.xlu0 %v2125_v61 }
 0xe00   :  { %v3692_v52 = vpop.f32.mrb[26].mxu0 }
 0xe01   :  { %v2120_v44 = vsel %vm4425_vm8, %v3692_v52, -100000.0  ;;  %v1934_v62 = vpop.f32.mrb[27].mxu0 }
 0xe02   :  { %v2134_v63 = vsel %vm611_vm10, %v2120_v44, -inf  ;;  %v2119_v2 = vsel %vm4429_vm9, %v1934_v62, -100000.0 }
 0xe03   :  { %2135 = vmax.xlane.f32.xlu0 %v2134_v63  ;;  %v2131_v3 = vsel %vm611_vm10, %v2119_v2, -inf }
 0xe07   :  { %2132 = vmax.xlane.f32.xlu0 %v2131_v3 }
 0xe08   :  { %v3699_v4 = vpop.f32.mrb[28].mxu0 }
 0xe09   :  { %v2122_v5 = vsel %vm4425_vm8, %v3699_v4, -100000.0  ;;  %v2021_v6 = vpop.f32.mrb[29].mxu0 }
 0xe0a   :  { %v2121_v7 = vsel %vm4429_vm9, %v2021_v6, -100000.0  ;;  %v2140_v8 = vsel %vm611_vm10, %v2122_v5, -inf }
 0xe0b   :  { %2141 = vmax.xlane.f32.xlu1 %v2140_v8  ;;  %v2137_v9 = vsel %vm611_vm10, %v2121_v7, -inf }
 0xe0c   :  { %v3706_v12 = vpop.f32.mrb[16].mxu1  ;;  %2138 = vmax.xlane.f32.xlu0 %v2137_v9 }
 0xe0d   :  { %v2124_v13 = vsel %vm4425_vm8, %v3706_v12, -100000.0  ;;  %v2108_v14 = vpop.f32.mrb[17].mxu1 }
 0xe0e   :  { %v2123_v16 = vsel %vm4429_vm9, %v2108_v14, -100000.0  ;;  %v2146_v17 = vsel %vm611_vm10, %v2124_v13, -inf }
 0xe0f   :  { %2147 = vmax.xlane.f32.xlu1 %v2146_v17  ;;  %v2143_v18 = vsel %vm611_vm10, %v2123_v16, -inf }
 0xe10   :  { %2144 = vmax.xlane.f32.xlu0 %v2143_v18 }
 0xe21   :  { %v2130_v19 = vpop.xlane.xlu1 %2129 }
 0xe22   :  { %v2150_v20 = vsub.f32 %v2118_v58, %v2130_v19  ;;  %v2127_v21 = vpop.xlane.xlu0 %2126 }
 0xe23   :  { %v2149_v22 = vsub.f32 %v2117_v38, %v2127_v21 }
 0xe24   :  { %v2159_v23 = vmul.f32 1.442695, %v2150_v20 }
 0xe25   :  { %v2157_v24 = vmul.f32 1.442695, %v2149_v22 }
 0xe26   :  { %4040 = vpow2.f32 %v2159_v23 }
 0xe27   :  { %4042 = vpow2.f32 %v2157_v24 }
 0xe30   :  { %v4702_v10 = vpop.eup %4040 }
 0xe31   :  { %v4043_v25 = vpop.eup %4042  ;;  %v2176_v11 = vsel %vm611_vm10, %v4702_v10, 0.0 }
 0xe32   :  { %2177 = vadd.xlane.f32.xlu1 %v2176_v11  ;;  %v2173_v26 = vsel %vm611_vm10, %v4043_v25, 0.0 }
 0xe33   :  { %2174 = vadd.xlane.f32.xlu0 %v2173_v26 }
 0xe90   :  { %v2136_v27 = vpop.xlane.xlu0 %2135 }
 0xe91   :  { %v2152_v29 = vsub.f32 %v2120_v44, %v2136_v27 }
 0xe93   :  { %v2163_v46 = vmul.f32 1.442695, %v2152_v29 }
 0xe94   :  { %v2133_v51 = vpop.xlane.xlu0 %2132 }
 0xe95   :  { %4044 = vpow2.f32 %v2163_v46  ;;  %v2151_v31 = vsub.f32 %v2119_v2, %v2133_v51 }
 0xe97   :  { %v2161_v55 = vmul.f32 1.442695, %v2151_v31 }
 0xe98   :  { %v2142_v41 = vpop.xlane.xlu1 %2141 }
 0xe99   :  { %4046 = vpow2.f32 %v2161_v55  ;;  %v2139_v32 = vpop.xlane.xlu0 %2138  ;;  %v2154_v33 = vsub.f32 %v2122_v5, %v2142_v41 }
 0xe9a   :  { %v2153_v34 = vsub.f32 %v2121_v7, %v2139_v32 }
 0xe9b   :  { %v2167_v48 = vmul.f32 1.442695, %v2154_v33 }
 0xe9c   :  { %v2148_v36 = vpop.xlane.xlu1 %2147  ;;  %v2165_v50 = vmul.f32 1.442695, %v2153_v34  ;;  %v3382_v34 = vld [vmem:[%s4878_s5 + $0x20] sm:$0xff] }
 0xe9d   :  { %v2156_v40 = vsub.f32 %v2124_v13, %v2148_v36  ;;  %v2145_v42 = vpop.xlane.xlu0 %2144  ;;  %v3383_v36 = vld [vmem:[%s4878_s5 + $0x28] sm:$0xff] }
 0xe9e   :  { %v2155_v43 = vsub.f32 %v2123_v16, %v2145_v42  ;;  %v3385_v42 = vld [vmem:[%s4878_s5 + $0x38] sm:$0xff] }
 0xe9f   :  { %v4707_v45 = vpop.eup %4044  ;;  %v2171_v49 = vmul.f32 1.442695, %v2156_v40  ;;  %v3384_v40 = vld [vmem:[%s4878_s5 + $0x30] sm:$0xff] }
 0xea0   :  { %v2169_v0 = vmul.f32 1.442695, %v2155_v43  ;;  %v2182_v53 = vsel %vm611_vm10, %v4707_v45, 0.0 }
 0xea1   :  { %4048 = vpow2.f32 %v2171_v49  ;;  %2183 = vadd.xlane.f32.xlu1 %v2182_v53 }
 0xea2   :  { %4050 = vpow2.f32 %v2169_v0 }
 0xea3   :  { %v4047_v54 = vpop.eup %4046  ;;  %4052 = vpow2.f32 %v2167_v48 }
 0xea4   :  { %4054 = vpow2.f32 %v2165_v50  ;;  %v2179_v56 = vsel %vm611_vm10, %v4047_v54, 0.0 }
 0xea5   :  { %2180 = vadd.xlane.f32.xlu0 %v2179_v56 }
 0xeab   :  { %v4712_v57 = vpop.eup %4048 }
 0xeac   :  { %v4051_v39 = vpop.eup %4050  ;;  %v2194_v58 = vsel %vm611_vm10, %v4712_v57, 0.0 }
 0xead   :  { %v4716_v59 = vpop.eup %4052  ;;  %2195 = vadd.xlane.f32.xlu1 %v2194_v58  ;;  %v2191_v38 = vsel %vm611_vm10, %v4051_v39, 0.0 }
 0xeae   :  { %v4055_v60 = vpop.eup %4054  ;;  %2192 = vadd.xlane.f32.xlu0 %v2191_v38  ;;  %v2188_v61 = vsel %vm611_vm10, %v4716_v59, 0.0 }
 0xeaf   :  { %v2185_v52 = vsel %vm611_vm10, %v4055_v60, 0.0 }
 0xeb1   :  { %2189 = vadd.xlane.f32.xlu1 %v2188_v61 }
 0xeb2   :  { %2186 = vadd.xlane.f32.xlu0 %v2185_v52 }
 0xebf   :  { %v2178_v2 = vpop.xlane.xlu1 %2177 }
 0xec0   :  { %v2175_v44 = vpop.xlane.xlu0 %2174 }
 0xec1   :  { %4056 = vrcp.f32 %v2175_v44 }
 0xec2   :  { %3952 = vrot.lane.b32.xlu1 %v4643_v30, %s4189_s25 }
 0xec6   :  { %3957 = vrot.lane.b32.xlu1 %v4648_v35, %s4189_s25 }
 0xec8   :  { %3947 = vrot.lane.b32.xlu0 %v4637_v28, %s4189_s25 }
 0xeca   :  { %3962 = vrot.lane.b32.xlu1 %v4656_v37, %s4189_s25 }
 0xecb   :  { %v4057_v62 = vpop.eup %4056 }
 0xecc   :  { %v2205_v63 = vmul.f32 %v4057_v62, %v4043_v25 }
 0xece   :  { %3711 = vmatprep.mubr.msk.f32.mxu0 %vm611_vm10, %v2205_v63 }
 0xf2e   :  { %v2184_v4 = vpop.xlane.xlu1 %2183 }
 0xf32   :  { %v2181_v3 = vpop.xlane.xlu0 %2180 }
 0xf33   :  { %4058 = vrcp.f32 %v2181_v3 }
 0xf34   :  { %4060 = vrcp.f32 %v2178_v2 }
 0xf35   :  { %4062 = vrcp.f32 %v2184_v4 }
 0xf3a   :  { %v2196_v5 = vpop.xlane.xlu1 %2195 }
 0xf3b   :  { %v2193_v30 = vpop.xlane.xlu0 %2192 }
 0xf3c   :  { %4064 = vrcp.f32 %v2193_v30 }
 0xf3d   :  { %v4059_v6 = vpop.eup %4058 }
 0xf3e   :  { %v2190_v35 = vpop.xlane.xlu1 %2189  ;;  %v2207_v7 = vmul.f32 %v4059_v6, %v4047_v54  ;;  %v4061_v16 = vpop.eup %4060 }
 0xf3f   :  { %v2187_v28 = vpop.xlane.xlu0 %2186  ;;  %v4063_v18 = vpop.eup %4062  ;;  %v2206_v26 = vmul.f32 %v4061_v16, %v4702_v10 }
 0xf40   :  { %4066 = vrcp.f32 %v2187_v28  ;;  %3718 = vmatprep.mubr.msk.f32.mxu1 %vm611_vm10, %v2207_v7  ;;  %v2208_v24 = vmul.f32 %v4063_v18, %v4707_v45 }
 0xf41   :  { %4068 = vrcp.f32 %v2190_v35  ;;  %v3395_v35 = vld [vmem:[%s4879_s6 + $0x1] ss:$0 sm:$0xff] }
 0xf42   :  { %v3953_v37 = vpop.permute.xlu1 %3952  ;;  %4070 = vrcp.f32 %v2196_v5 }
 0xf43   :  { %v3955_v8 = vunpack.i.h.bf16 %v3953_v37  ;;  %v3954_v9 = vunpack.i.l.bf16 %v3953_v37  ;;  %v3948_v12 = vpop.permute.xlu0 %3947 }
 0xf44   :  { %v3950_v13 = vunpack.i.h.bf16 %v3948_v12  ;;  %v3949_v14 = vunpack.i.l.bf16 %v3948_v12 }
 0xf45   :  { %v3859_v17 = vpack.c.bf16 %v3955_v8, %v3954_v9 }
 0xf46   :  { %v3855_v19 = vpack.c.bf16 %v3950_v13, %v3949_v14  ;;  %v3958_v20 = vpop.permute.xlu1 %3957  ;;  %v4065_v21 = vpop.eup %4064 }
 0xf47   :  { %v3960_v22 = vunpack.i.h.bf16 %v3958_v20  ;;  %v3959_v23 = vunpack.i.l.bf16 %v3958_v20  ;;  %3860 = vmatprep.subr.bf16.mxu1 %v3859_v17  ;;  %v2211_v29 = vmul.f32 %v4065_v21, %v4051_v39 }
 0xf48   :  { %3856 = vmatprep.subr.bf16.mxu0 %v3855_v19  ;;  %3862 = vmatpush3.bf16.msra.mxu1 %v3859_v17 }
 0xf49   :  { %v3863_v25 = vpack.c.bf16 %v3960_v22, %v3959_v23  ;;  %3858 = vmatpush3.bf16.msra.mxu0 %v3855_v19 }
 0xf4a   :  { %v4067_v11 = vpop.eup %4066  ;;  %v3963_v27 = vpop.permute.xlu1 %3962 }
 0xf4b   :  { %v4069_v46 = vpop.eup %4068  ;;  %v3965_v51 = vunpack.i.h.bf16 %v3963_v27  ;;  %v3964_v31 = vunpack.i.l.bf16 %v3963_v27  ;;  %3719 = vmatmul.mubr.msk.f32.vlgmr.msra.gmra.mrb[18].mxu1 %vm611_vm10, %v2208_v24  ;;  %3864 = vmatprep.subr.bf16.mxu0 %v3863_v25  ;;  %v2209_v55 = vmul.f32 %v4067_v11, %v4055_v60  ;;  %v3980_v11 = vld [vmem:[%s4882_s9 + $0x10] sm:$0xff]   ;;  %v3982_v27 = vld [vmem:[%s4884_s11 + $0x40] sm:$0xff]  }
 0xf4c   :  { %3712 = vmatmul.mubr.msk.f32.vlgmr.msra.gmra.mrb[30].mxu0 %vm611_vm10, %v2206_v26  ;;  %3732 = vmatprep.mubr.msk.f32.mxu1 %vm611_vm10, %v2211_v29  ;;  %v4071_v32 = vpop.eup %4070  ;;  %v2210_v10 = vmul.f32 %v4069_v46, %v4716_v59  ;;  %v3981_v26 = vld [vmem:[%s4882_s9 + $0x18] sm:$0xff]   ;;  %v3983_v29 = vld [vmem:[%s4884_s11 + $0x48] sm:$0xff]  }
 0xf4d   :  { %v3867_v41 = vpack.c.bf16 %v3965_v51, %v3964_v31  ;;  %3866 = vmatpush3.bf16.msra.mxu0 %v3863_v25  ;;  %3725 = vmatprep.mubr.msk.f32.mxu0 %vm611_vm10, %v2209_v55  ;;  %v2212_v33 = vmul.f32 %v4071_v32, %v4712_v57 }
 0xf4e   :  { %3735 = vmatprep.subr.mxu0 %v3382_v34 }
 0xf4f   :  { %3868 = vmatprep.subr.bf16.mxu1 %v3867_v41 }
 0xf50   :  { %3726 = vmatmul.mubr.msk.f32.vlgmr.msra.gmra.mrb[32].mxu0 %vm611_vm10, %v2210_v10  ;;  %3870 = vmatpush3.bf16.msra.mxu1 %v3867_v41 }
 0xf51   :  { %3740 = vmatprep.subr.mxu1 %v3383_v36  ;;  %3736 = vmatpush3.msra.mxu0 %v3382_v34  ;;  %v3396_v34 = vld [vmem:[#allocation2 + $0x1] ss:$0 sm:$0xff] }
 0xf52   :  { %3745 = vmatprep.subr.mxu0 %v3384_v40 }
 0xf53   :  { %3733 = vmatmul.mubr.msk.f32.vlgmr.msra.gmra.mrb[20].mxu1 %vm611_vm10, %v2212_v33 }
 0xf54   :  { %3741 = vmatpush3.msra.mxu1 %v3383_v36 }
 0xf55   :  { %3750 = vmatprep.subr.mxu1 %v3385_v42 }
0x101e   :  { %v3720_v43 = vpop.f32.mrb[18].mxu1 }
0x101f   :  { %v3713_v45 = vpop.f32.mrb[30].mxu0  ;;  %v2378_v48 = vpop.f32.mrb[19].mxu1 }
0x1020   :  { %v2291_v49 = vpop.f32.mrb[31].mxu0  ;;  %3742 = vmatprep.mubr.msk.f32.mxu1 %vm254_vm2, %v2378_v48 }
0x1021   :  { %3737 = vmatprep.mubr.msk.f32.mxu0 %vm254_vm2, %v2291_v49  ;;  %3743 = vmatmul.mubr.msk.f32.vlgmr.msra.gmra.mrb[22].mxu1 %vm254_vm2, %v3720_v43  ;;  %v3397_v43 = vld [vmem:[#allocation5 + $0x1] ss:$0 sm:$0xff] }
0x1022   :  { %3738 = vmatmul.mubr.msk.f32.vlgmr.msra.gmra.mrb[34].mxu0 %vm254_vm2, %v3713_v45  ;;  %3751 = vmatpush3.msra.mxu1 %v3385_v42 }
0x1023   :  { %v3727_v50 = vpop.f32.mrb[32].mxu0  ;;  %3746 = vmatpush3.msra.mxu0 %v3384_v40  ;;  %3763 = vmatprep.subr.bf16.mxu1 %v4183_v15 }
0x1024   :  { %v2465_v0 = vpop.f32.mrb[33].mxu0  ;;  %3755 = vmatprep.subr.bf16.mxu0 %v4183_v15 }
0x1025   :  { %3747 = vmatprep.mubr.msk.f32.mxu0 %vm254_vm2, %v2465_v0  ;;  %v3984_v0 = vld [vmem:[%s4884_s11 + $0x50] sm:$0xff]  }
0x1026   :  { %v3734_v53 = vpop.f32.mrb[20].mxu1  ;;  %3748 = vmatmul.mubr.msk.f32.vlgmr.msra.gmra.mrb[36].mxu0 %vm254_vm2, %v3727_v50 }
0x1027   :  { %v2552_v54 = vpop.f32.mrb[21].mxu1  ;;  %3759 = vmatprep.mubr.msk.bf16.mxu0 %vm4184_vm1, %v4183_v15  ;;  %3756 = vmatpush3.bf16.msra.mxu0 %v3980_v11 }
0x1028   :  { %3752 = vmatprep.mubr.msk.f32.mxu1 %vm254_vm2, %v2552_v54  ;;  %3757 = vmatprep.subr.bf16.mxu0 %v4183_v15  ;;  %v3986_v54 = vld [vmem:[%s4884_s11 + $0x60] sm:$0xff]  }
0x1029   :  { %3753 = vmatmul.mubr.msk.f32.vlgmr.msra.gmra.mrb[24].mxu1 %vm254_vm2, %v3734_v53  ;;  %v3985_v53 = vld [vmem:[%s4884_s11 + $0x58] sm:$0xff]  }
0x102a   :  { %3779 = vmatprep.mubr.msk.bf16.mxu1 %vm4184_vm1, %v4183_v15  ;;  %3764 = vmatpush3.bf16.msra.mxu1 %v3982_v27 }
0x102b   :  { %3758 = vmatpush3.bf16.msra.mxu0 %v3981_v26  ;;  %3765 = vmatprep.subr.bf16.mxu1 %v4183_v15 }
0x102c   :  { %3783 = vmatprep.subr.bf16.mxu0 %v4183_v15 }
0x102e   :  { %3766 = vmatpush3.bf16.msra.mxu1 %v3983_v29 }
0x102f   :  { %3767 = vmatprep.subr.bf16.mxu1 %v4183_v15 }
0x1032   :  { %3768 = vmatpush3.bf16.msra.mxu1 %v3984_v0  ;;  %v3434_v0 = vld [vmem:[%s4889_s16] ss:$0 sm:$0xff] }
0x1033   :  { %3769 = vmatprep.subr.bf16.mxu1 %v4183_v15 }
0x1036   :  { %3770 = vmatpush3.bf16.msra.mxu1 %v3985_v53 }
0x1037   :  { %3771 = vmatprep.subr.bf16.mxu1 %v4183_v15 }
0x103a   :  { %3772 = vmatpush3.bf16.msra.mxu1 %v3986_v54 }
0x103b   :  { %3773 = vmatprep.subr.bf16.mxu1 %v4183_v15 }
0x10f4   :  { %v3744_v56 = vpop.f32.mrb[22].mxu1 }
0x10f5   :  { %v2898_v57 = vsel %vm124_vm0, %v3744_v56, 0.0  ;;  %v3739_v39 = vpop.f32.mrb[34].mxu0  ;;  %v2719_v58 = vpop.f32.mrb[23].mxu1  ;;  %v3987_v56 = vld [vmem:[%s4884_s11 + $0x68] sm:$0xff]  }
0x10f6   :  { %v2897_v59 = vsel %vm124_vm0, %v3739_v39, 0.0  ;;  %v2891_v38 = vsel %vm124_vm0, %v2719_v58, 0.0  ;;  %v2638_v60 = vpop.f32.mrb[35].mxu0  ;;  %3774 = vmatpush3.bf16.msra.mxu1 %v3987_v56  ;;  %v3989_v39 = vld [vmem:[%s4884_s11 + $0x78] sm:$0xff]   ;;  %v3402_v58 = vld [vmem:[#allocation7 + $0x1] ss:$0 sm:$0xff] }
0x10f7   :  { %v2899_v61 = vadd.f32 %v2898_v57, %v2897_v59  ;;  %v2890_v52 = vsel %vm124_vm0, %v2638_v60, 0.0  ;;  %3775 = vmatprep.subr.bf16.mxu1 %v4183_v15  ;;  %v3988_v57 = vld [vmem:[%s4884_s11 + $0x70] sm:$0xff]  }
0x10f8   :  { %v2892_v44 = vadd.f32 %v2891_v38, %v2890_v52 }
0x10f9   :  { %v3749_v62 = vpop.f32.mrb[36].mxu0 }
0x10fa   :  { %v2900_v63 = vsel %vm124_vm0, %v3749_v62, 0.0  ;;  %v2800_v2 = vpop.f32.mrb[37].mxu0  ;;  %3776 = vmatpush3.bf16.msra.mxu1 %v3988_v57 }
0x10fb   :  { %v2901_v3 = vadd.f32 %v2900_v63, %v2899_v61  ;;  %v2893_v4 = vsel %vm124_vm0, %v2800_v2, 0.0  ;;  %3777 = vmatprep.subr.bf16.mxu1 %v4183_v15 }
0x10fc   :  { %v2894_v5 = vadd.f32 %v2893_v4, %v2892_v44  ;;  %v3754_v30 = vpop.f32.mrb[24].mxu1 }
0x10fd   :  { %v2902_v6 = vsel %vm124_vm0, %v3754_v30, 0.0  ;;  %v2881_v7 = vpop.f32.mrb[25].mxu1 }
0x10fe   :  { %v2903_v28 = vadd.f32 %v2902_v6, %v2901_v3  ;;  %v2895_v37 = vsel %vm124_vm0, %v2881_v7, 0.0  ;;  %3778 = vmatpush3.bf16.msra.mxu1 %v3989_v39 }
0x10ff   :  { %v2896_v8 = vadd.f32 %v2895_v37, %v2894_v5  ;;  %v3423_v37 = vld [vmem:[%s4885_s12 + $0x1] ss:$0 sm:$0xff] }
0x1100   :  { %v2913_v9 = vadd.f32 %v3395_v35, %v2903_v28 }
0x1101   :  { %v2912_v12 = vadd.f32 %v3395_v35, %v2896_v8 }
0x1102   :  { %v4780_v13 = vadd.f32 %v2913_v9, %v4605_v1 }
0x1103   :  { %v4783_v14 = vadd.f32 %v2912_v12, %v4602_v47 }
0x1104   :  { %v2923_v16 = vsel %vm124_vm0, %v4780_v13, 0.0 }
0x1105   :  { %2924 = vadd.xlane.f32.xlu1 %v2923_v16  ;;  %v2920_v17 = vsel %vm124_vm0, %v4783_v14, 0.0 }
0x1106   :  { %2921 = vadd.xlane.f32.xlu0 %v2920_v17 }
0x1192   :  { %v2925_v18 = vpop.xlane.xlu1 %2924 }
0x1193   :  { %v2927_v19 = vmul.f32 0.03125, %v2925_v18  ;;  %v2922_v20 = vpop.xlane.xlu0 %2921 }
0x1194   :  { %v2926_v21 = vmul.f32 0.03125, %v2922_v20 }
0x1195   :  { %v2929_v22 = vsub.f32 %v4780_v13, %v2927_v19 }
0x1196   :  { %v2928_v1 = vsub.f32 %v4783_v14, %v2926_v21 }
0x1197   :  { %v2931_v24 = vmul.f32 %v2929_v22, %v2929_v22 }
0x1198   :  { %v2930_v23 = vmul.f32 %v2928_v1, %v2928_v1 }
0x1199   :  { %v2935_v25 = vsel %vm124_vm0, %v2931_v24, 0.0 }
0x119a   :  { %v2932_v47 = vsel %vm124_vm0, %v2930_v23, 0.0 }
0x119b   :  { %2933 = vadd.xlane.f32.xlu0 %v2932_v47 }
0x119f   :  { %2936 = vadd.xlane.f32.xlu0 %v2935_v25 }
0x1228   :  { %v2934_v46 = vpop.xlane.xlu0 %2933 }
0x1229   :  { %v2938_v51 = vmul.f32 0.03125, %v2934_v46  ;;  %v3991_v46 = vld [vmem:[%s4888_s15 + $0x8] sm:$0xff]  }
0x122b   :  { %v2940_v31 = vadd.f32 1e-05, %v2938_v51 }
0x122c   :  { %v2937_v55 = vpop.xlane.xlu0 %2936 }
0x122d   :  { %4072 = vrsqrt.f32 %v2940_v31  ;;  %v2939_v41 = vmul.f32 0.03125, %v2937_v55 }
0x122f   :  { %v2941_v32 = vadd.f32 1e-05, %v2939_v41 }
0x1231   :  { %4074 = vrsqrt.f32 %v2941_v32 }
0x1237   :  { %v4073_v10 = vpop.eup %4072 }
0x1238   :  { %v2944_v33 = vmul.f32 %v4073_v10, %v2928_v1 }
0x123a   :  { %v2952_v40 = vmul.f32 %v3396_v34, %v2944_v33 }
0x123b   :  { %v4075_v36 = vpop.eup %4074 }
0x123c   :  { %v2945_v42 = vmul.f32 %v4075_v36, %v2929_v22  ;;  %v2960_v48 = vadd.f32 %v3397_v43, %v2952_v40 }
0x123e   :  { %v2953_v45 = vmul.f32 %v3396_v34, %v2945_v42  ;;  %v3432_v34 = vld [vmem:[%s4886_s13] ss:$0 sm:$0xff]  ;;  %s4190_s13 = smov [#allocation8]  }
0x123f   :  { %s3278_s18 = sshll.u32 %s4190_s13, 4  ;;  %s3279_s18 = int_to_ptr.vmem [resolvable:$true] %s3278_s18 }
0x1240   :  { %v2961_v49 = vadd.f32 %v3397_v43, %v2953_v45  ;;  %p4155_p11 = scmp.lt.s32.totalorder %s3279_s18, %s3279_s18 }
0x1242   :  { %v2962_v50 = vpack.c.bf16 %v2961_v49, %v2960_v48 }
0x1244   :  { %3760 = vmatmul.mubr.msk.bf16.vlgmr.msra.gmra.mrb[40].mxu0 %vm124_vm0, %v2962_v50 }
0x1245   :  { %3787 = vmatprep.mubr.msk.bf16.mxu0 %vm4184_vm1, %v4183_v15 }
0x1317   :  { %v3025_v59 = vpop.f32.mrb[40].mxu0 }
0x1318   :  { %v3026_v38 = vadd.f32 %v3402_v58, %v3025_v59  ;;  %v3761_v60 = vpop.f32.mrb[41].mxu0 }
0x1319   :  { %v3028_v61 = vpop.f32.mrb[42].mxu0 }
0x131a   :  { %v3034_v52 = vmul.f32 0.70710677, %v3026_v38  ;;  %v3029_v44 = vadd.f32 %v3402_v58, %v3028_v61  ;;  %v3762_v62 = vpop.f32.mrb[43].mxu0  ;;  %v3032_v5 = vmul.f32 0.5, %v3026_v38 }
0x131c   :  { %4076 = verf.f32 %v3034_v52  ;;  %v3035_v63 = vmul.f32 0.70710677, %v3029_v44  ;;  %v3033_v30 = vmul.f32 0.5, %v3029_v44 }
0x131e   :  { %4078 = verf.f32 %v3035_v63 }
0x1326   :  { %v4077_v2 = vpop.eup %4076 }
0x1327   :  { %v3038_v3 = vadd.f32 1.0, %v4077_v2 }
0x1328   :  { %v4079_v4 = vpop.eup %4078 }
0x1329   :  { %v3039_v6 = vadd.f32 1.0, %v4079_v4  ;;  %v3040_v35 = vmul.f32 %v3038_v3, %v3032_v5 }
0x132b   :  { %v3041_v7 = vmul.f32 %v3039_v6, %v3033_v30 }
0x132d   :  { %v3042_v28 = vpack.c.bf16 %v3041_v7, %v3040_v35 }
0x132f   :  { %3780 = vmatmul.mubr.bf16.vlgmr.msra.gmra.mrb[28].mxu1 %v3042_v28 }
0x1402   :  { %v3150_v8 = vpop.f32.mrb[28].mxu1 }
0x1403   :  { %v3151_v9 = vadd.f32 %v3423_v37, %v3150_v8  ;;  %v3781_v12 = vpop.f32.mrb[29].mxu1 }
0x1404   :  { %v3153_v16 = vpop.f32.mrb[30].mxu1 }
0x1405   :  { %v3154_v17 = vadd.f32 %v3423_v37, %v3153_v16  ;;  %v3782_v18 = vpop.f32.mrb[31].mxu1  ;;  %v3157_v19 = vadd.f32 %v3151_v9, %v4783_v14 }
0x1407   :  { %v3161_v20 = vsel %vm124_vm0, %v3157_v19, 0.0  ;;  %v3158_v21 = vadd.f32 %v3154_v17, %v4780_v13  ;;  %v3990_v13 = vld [vmem:[%s4888_s15] sm:$0xff]  }
0x1408   :  { %3162 = vadd.xlane.f32.xlu0 %v3161_v20  ;;  %3784 = vmatpush3.bf16.msra.mxu0 %v3990_v13 }
0x1409   :  { %v3164_v22 = vsel %vm124_vm0, %v3158_v21, 0.0  ;;  %3785 = vmatprep.subr.bf16.mxu0 %v4183_v15  ;;  %v3433_v15 = vld [vmem:[%s4887_s14] ss:$0 sm:$0xff]  ;;  %s4150_s14 = scalar_lea.vmem %s3279_s18, 256 }
0x140a   :  { %3165 = vadd.xlane.f32.xlu1 %v3164_v22  ;;  %p4151_p10 = scmp.ne.s32.totalorder %s3279_s18, %s4150_s14  ;;  %p4156_p12 = scmp.lt.s32.totalorder %s4150_s14, %s4150_s14 }
0x140c   :  { %3786 = vmatpush3.bf16.msra.mxu0 %v3991_v46  ;;  %p4157_p13 = por %p4156_p12, %p4155_p11 }
0x140e   :  { %p4158_p0 = pnand %p4157_p13, %p4151_p10 }
0x1495   :  { %v3163_v1 = vpop.xlane.xlu0 %3162 }
0x1496   :  { %v3167_v23 = vmul.f32 0.03125, %v3163_v1 }
0x1497   :  { %v3166_v47 = vpop.xlane.xlu1 %3165 }
0x1498   :  { %v3169_v24 = vsub.f32 %v3157_v19, %v3167_v23  ;;  %v3168_v25 = vmul.f32 0.03125, %v3166_v47 }
0x149a   :  { %v3170_v11 = vsub.f32 %v3158_v21, %v3168_v25  ;;  %v3171_v26 = vmul.f32 %v3169_v24, %v3169_v24 }
0x149c   :  { %v3173_v27 = vsel %vm124_vm0, %v3171_v26, 0.0  ;;  %v3172_v29 = vmul.f32 %v3170_v11, %v3170_v11 }
0x149d   :  { %3174 = vadd.xlane.f32.xlu0 %v3173_v27 }
0x149e   :  { %v3176_v14 = vsel %vm124_vm0, %v3172_v29, 0.0 }
0x149f   :  { %3177 = vadd.xlane.f32.xlu1 %v3176_v14 }
0x152a   :  { %v3175_v51 = vpop.xlane.xlu0 %3174 }
0x152b   :  { %v3179_v31 = vmul.f32 0.03125, %v3175_v51 }
0x152c   :  { %v3178_v55 = vpop.xlane.xlu1 %3177 }
0x152d   :  { %v3181_v41 = vadd.f32 1e-05, %v3179_v31  ;;  %v3180_v32 = vmul.f32 0.03125, %v3178_v55 }
0x152f   :  { %4080 = vrsqrt.f32 %v3181_v41  ;;  %v3182_v10 = vadd.f32 1e-05, %v3180_v32 }
0x1531   :  { %4082 = vrsqrt.f32 %v3182_v10 }
0x1539   :  { %v4081_v33 = vpop.eup %4080 }
0x153a   :  { %v3185_v36 = vmul.f32 %v4081_v33, %v3169_v24 }
0x153b   :  { %v4083_v40 = vpop.eup %4082 }
0x153c   :  { %v3193_v42 = vmul.f32 %v3432_v34, %v3185_v36  ;;  %v3186_v43 = vmul.f32 %v4083_v40, %v3170_v11 }
0x153e   :  { %v3194_v45 = vmul.f32 %v3432_v34, %v3186_v43  ;;  %v3201_v48 = vadd.f32 %v3433_v15, %v3193_v42 }
0x1540   :  { %v3202_v49 = vadd.f32 %v3433_v15, %v3194_v45 }
0x1542   :  { %v3203_v50 = vpack.c.bf16 %v3202_v49, %v3201_v48 }
0x1544   :  { %3788 = vmatmul.mubr.msk.bf16.vlgmr.msra.gmra.mrb[44].mxu0 %vm124_vm0, %v3203_v50 }
0x1617   :  { %v3264_v53 = vpop.f32.mrb[44].mxu0 }
0x1618   :  { %v3265_v54 = vadd.f32 %v3434_v0, %v3264_v53  ;;  %v3789_v56 = vpop.f32.mrb[45].mxu0 }
0x1619   :  { %v3267_v57 = vpop.f32.mrb[46].mxu0 }
0x161a   :  { %3271 = vst [vmem:[#allocation8] sm:$0xff] %v3265_v54  ;;  %v3268_v39 = vadd.f32 %v3434_v0, %v3267_v57  ;;  %v3790_v58 = vpop.f32.mrb[47].mxu0 }
0x161c   :  { %3272 = vst [vmem:[#allocation8 + $0x8] sm:$0xff] %v3268_v39 }
0x161d   :  { %4161 = shalt.err (!%p4158_p0)
}
0x161e   :  { %s4162_s20 = scalar_lea.hbm %s4890_s17, 256 }
0x161f   :  { %p4163_p1 = scmp.ne.s32.totalorder %s4890_s17, %s4162_s20  ;;  %p4166_p2 = scmp.lt.u32.totalorder %s4162_s20, %s4890_s17 }
0x1621   :  { %p4168_p3 = pnand %p4166_p2, %p4163_p1 }
0x1623   :  { %4171 = shalt.err (!%p4168_p3)
}
0x1624   :  { %s4191_s21 = smov 128   ;;  %s4192_s22 = smov 8  }
0x1625   :  { %3284 = dma.vmem_to_hbm [thread:$0]  %s3279_s18, 256, %s4890_s17, [#allocation4], %s4191_s21, %s4191_s21, %s4192_s22  }
0x1626   :  { %4176 = dma.done.wait [#allocation4], 256  }
0x1627   :  { %4177 = vsyncadd [#allocation4], 4294967040 }
0x1628   :  { %3288 = vsyncpa [#allocation3], 1 }
0x1629   :  { %3289 = vsyncpa [#allocation6], 1 }
0x162a   :  { %3290 = vsyncpa [#allocation4], 1 }

</bundles_post_ra>
